<compile_context>
chip_gen: v7x
topology: tpu7x:2x2x1
jax: 0.10.0
libtpu: 0.0.40
codegen_flags: <defaults>
</compile_context>

<pallas_src>
import jax
import jax.numpy as jnp
from jax.experimental import pallas as pl
from jax.experimental.pallas import tpu as pltpu

ROWS, COLS = 6, 7
IN_FEATS = ROWS * COLS          # 42
CHANS = 150
EXPANSION = 2
MID = CHANS * EXPANSION         # 300

DEFAULT_BATCH_TILE = 512        # 8-aligned; past the ~0.35 us/step overhead knee


def _round_up(x, m):
    return (x + m - 1) // m * m


def _dot(x_f32, w_bf16):
    """bf16 x bf16 MXU matmul with f32 accumulation."""
    return jnp.dot(x_f32.astype(jnp.bfloat16), w_bf16,
                   preferred_element_type=jnp.float32)


def _forward(x,
             l1w, l1b,
             b1w1, b1b1, b1w2, b1b2, b1w3, b1b3,
             b2w1, b2b1, b2w2, b2b2, b2w3, b2b3,
             l2w, l2b):
    """Pure math shared by the kernel and the JAX reference (f32 activations)."""
    h = jax.nn.sigmoid(_dot(x, l1w) + l1b)                          # (TB, 150)

    def bottleneck(h, w1, b1, w2, b2, w3, b3):
        y = jnp.maximum(_dot(h, w1) + b1, 0.0)                      # (TB, 300)
        y = jnp.maximum(_dot(y, w2) + b2, 0.0)                      # (TB, 300)
        # fused bias + relu + residual in one VPU pass
        y = h + jnp.maximum(_dot(y, w3) + b3, 0.0)                  # (TB, 150)
        # TODO(synk): nn.Dropout(0.5) is stochastic in training mode; it is the
        # identity in eval mode, which is what we implement here.
        return y

    h = bottleneck(h, b1w1, b1b1, b1w2, b1b2, b1w3, b1b3)
    h = bottleneck(h, b2w1, b2b1, b2w2, b2b2, b2w3, b2b3)

    o = _dot(h, l2w) + l2b                                          # (TB, 7)
    return jax.nn.sigmoid(o) * 6.0 - 3.0


def dqn_kernel(*refs):
    x_ref, *param_refs, out_ref = refs
    out_ref[...] = _forward(x_ref[...], *(r[...] for r in param_refs))


def init_params(key):
    """PyTorch-style init U(-1/sqrt(fan_in), 1/sqrt(fan_in)).
    Weights pre-transposed (in, out) in bf16; biases (1, out) in f32."""
    def linear(key, fan_in, fan_out):
        kw, kb = jax.random.split(key)
        bound = 1.0 / jnp.sqrt(jnp.float32(fan_in))
        w = jax.random.uniform(kw, (fan_in, fan_out), jnp.float32, -bound, bound)
        b = jax.random.uniform(kb, (1, fan_out), jnp.float32, -bound, bound)
        return w.astype(jnp.bfloat16), b

    keys = jax.random.split(key, 8)
    params = []
    params += linear(keys[0], IN_FEATS, CHANS)   # l1
    params += linear(keys[1], CHANS, MID)        # b1.l1
    params += linear(keys[2], MID, MID)          # b1.l2
    params += linear(keys[3], MID, CHANS)        # b1.l3
    params += linear(keys[4], CHANS, MID)        # b2.l1
    params += linear(keys[5], MID, MID)          # b2.l2
    params += linear(keys[6], MID, CHANS)        # b2.l3
    params += linear(keys[7], CHANS, COLS)       # l2
    return params


def full_channel_dqn_v2(x, params, *, batch_tile=DEFAULT_BATCH_TILE):
    """x: (B, rows, cols) board -> (B, cols) Q-values in (-3, 3)."""
    B = x.shape[0]
    x_flat = x.reshape(B, -1).astype(jnp.float32)                   # (B, 42)

    # 8-aligned batch tile, never larger than needed; pad batch to a multiple.
    tb = min(_round_up(batch_tile, 8), _round_up(B, 8))
    tb = max(tb, 8)
    b_pad = _round_up(B, tb)
    if b_pad != B:
        x_flat = jnp.pad(x_flat, ((0, b_pad - B), (0, 0)))
    n_blocks = b_pad // tb

    # x/out tiled over batch; params are full-array blocks with a constant
    # index_map so they stay resident in VMEM across all grid steps.
    in_specs = [pl.BlockSpec((tb, IN_FEATS), lambda i: (i, 0))]
    in_specs += [pl.BlockSpec(p.shape, lambda i: (0, 0)) for p in params]
    out_spec = pl.BlockSpec((tb, COLS), lambda i: (i, 0))

    out = pl.pallas_call(
        dqn_kernel,
        out_shape=jax.ShapeDtypeStruct((b_pad, COLS), jnp.float32),
        grid=(n_blocks,),
        in_specs=in_specs,
        out_specs=out_spec,
        compiler_params=pltpu.CompilerParams(
            dimension_semantics=("parallel",),     # megacore sharding on v7x
            vmem_limit_bytes=48 * 1024 * 1024,     # safe on v5e/v6e/v7x
        ),
    )(x_flat, *params)

    return out[:B]


if __name__ == "__main__":
    key = jax.random.PRNGKey(0)
    k_params, k_x1, k_x2 = jax.random.split(key, 3)

    params = init_params(k_params)

    # --- small online-inference batch (B=2) ---
    B1 = 2
    x1 = jax.random.randint(k_x1, (B1, ROWS, COLS), -1, 2).astype(jnp.float32)
    out1 = jax.block_until_ready(full_channel_dqn_v2(x1, params))
    ref1 = _forward(x1.reshape(B1, -1).astype(jnp.float32), *params)

    assert out1.shape == (B1, COLS), out1.shape
    assert out1.dtype == jnp.float32, out1.dtype
    assert bool(jnp.all(jnp.isfinite(out1)))
    assert bool(jnp.all(out1 > -3.0)) and bool(jnp.all(out1 < 3.0))
    assert bool(jnp.max(jnp.abs(out1 - ref1)) < 5e-2), \
        float(jnp.max(jnp.abs(out1 - ref1)))

    # --- batch that is not a multiple of the tile (exercises grid + padding) ---
    B2 = 600
    x2 = jax.random.randint(k_x2, (B2, ROWS, COLS), -1, 2).astype(jnp.float32)
    out2 = jax.block_until_ready(full_channel_dqn_v2(x2, params))
    ref2 = _forward(x2.reshape(B2, -1).astype(jnp.float32), *params)

    assert out2.shape == (B2, COLS), out2.shape
    assert bool(jnp.all(jnp.isfinite(out2)))
    assert bool(jnp.all(out2 > -3.0)) and bool(jnp.all(out2 < 3.0))
    assert bool(jnp.max(jnp.abs(out2 - ref2)) < 5e-2), \
        float(jnp.max(jnp.abs(out2 - ref2)))

    print("KERNEL_OK")
</pallas_src>

<mosaic_0001>
module attributes {stable_mosaic.version = 11 : i64} {
  func.func @dqn_kernel(%arg0: i32, %arg1: memref<8x42xf32, #tpu.memory_space<vmem>>, %arg2: memref<42x150xbf16, #tpu.memory_space<vmem>>, %arg3: memref<1x150xf32, #tpu.memory_space<vmem>>, %arg4: memref<150x300xbf16, #tpu.memory_space<vmem>>, %arg5: memref<1x300xf32, #tpu.memory_space<vmem>>, %arg6: memref<300x300xbf16, #tpu.memory_space<vmem>>, %arg7: memref<1x300xf32, #tpu.memory_space<vmem>>, %arg8: memref<300x150xbf16, #tpu.memory_space<vmem>>, %arg9: memref<1x150xf32, #tpu.memory_space<vmem>>, %arg10: memref<150x300xbf16, #tpu.memory_space<vmem>>, %arg11: memref<1x300xf32, #tpu.memory_space<vmem>>, %arg12: memref<300x300xbf16, #tpu.memory_space<vmem>>, %arg13: memref<1x300xf32, #tpu.memory_space<vmem>>, %arg14: memref<300x150xbf16, #tpu.memory_space<vmem>>, %arg15: memref<1x150xf32, #tpu.memory_space<vmem>>, %arg16: memref<150x7xbf16, #tpu.memory_space<vmem>>, %arg17: memref<1x7xf32, #tpu.memory_space<vmem>>, %arg18: memref<8x7xf32, #tpu.memory_space<vmem>>) attributes {dimension_semantics = [#tpu.dimension_semantics<parallel>], iteration_bounds = array<i64: 1>, scalar_prefetch = 0 : i64, scratch_operands = 0 : i64, tpu.core_type = #tpu.core_type<tc>, window_params = [{transform_indices = @transform_0, window_bounds = array<i64: 8, 42>}, {pipeline_mode = #tpu.pipeline_mode<synchronous>, transform_indices = @transform_1, window_bounds = array<i64: 42, 150>}, {pipeline_mode = #tpu.pipeline_mode<synchronous>, transform_indices = @transform_2, window_bounds = array<i64: 1, 150>}, {pipeline_mode = #tpu.pipeline_mode<synchronous>, transform_indices = @transform_3, window_bounds = array<i64: 150, 300>}, {pipeline_mode = #tpu.pipeline_mode<synchronous>, transform_indices = @transform_4, window_bounds = array<i64: 1, 300>}, {pipeline_mode = #tpu.pipeline_mode<synchronous>, transform_indices = @transform_5, window_bounds = array<i64: 300, 300>}, {pipeline_mode = #tpu.pipeline_mode<synchronous>, transform_indices = @transform_6, window_bounds = array<i64: 1, 300>}, {pipeline_mode = #tpu.pipeline_mode<synchronous>, transform_indices = @transform_7, window_bounds = array<i64: 300, 150>}, {pipeline_mode = #tpu.pipeline_mode<synchronous>, transform_indices = @transform_8, window_bounds = array<i64: 1, 150>}, {pipeline_mode = #tpu.pipeline_mode<synchronous>, transform_indices = @transform_9, window_bounds = array<i64: 150, 300>}, {pipeline_mode = #tpu.pipeline_mode<synchronous>, transform_indices = @transform_10, window_bounds = array<i64: 1, 300>}, {pipeline_mode = #tpu.pipeline_mode<synchronous>, transform_indices = @transform_11, window_bounds = array<i64: 300, 300>}, {pipeline_mode = #tpu.pipeline_mode<synchronous>, transform_indices = @transform_12, window_bounds = array<i64: 1, 300>}, {pipeline_mode = #tpu.pipeline_mode<synchronous>, transform_indices = @transform_13, window_bounds = array<i64: 300, 150>}, {pipeline_mode = #tpu.pipeline_mode<synchronous>, transform_indices = @transform_14, window_bounds = array<i64: 1, 150>}, {pipeline_mode = #tpu.pipeline_mode<synchronous>, transform_indices = @transform_15, window_bounds = array<i64: 150, 7>}, {pipeline_mode = #tpu.pipeline_mode<synchronous>, transform_indices = @transform_16, window_bounds = array<i64: 1, 7>}, {transform_indices = @transform_17, window_bounds = array<i64: 8, 7>}]} {
    %c0 = arith.constant 0 : index
    %c0_0 = arith.constant 0 : index
    %0 = vector.load %arg1[%c0, %c0_0] : memref<8x42xf32, #tpu.memory_space<vmem>>, vector<8x42xf32>
    %c0_1 = arith.constant 0 : index
    %c0_2 = arith.constant 0 : index
    %1 = vector.load %arg2[%c0_1, %c0_2] : memref<42x150xbf16, #tpu.memory_space<vmem>>, vector<42x150xbf16>
    %c0_3 = arith.constant 0 : index
    %c0_4 = arith.constant 0 : index
    %2 = vector.load %arg3[%c0_3, %c0_4] : memref<1x150xf32, #tpu.memory_space<vmem>>, vector<1x150xf32>
    %c0_5 = arith.constant 0 : index
    %c0_6 = arith.constant 0 : index
    %3 = vector.load %arg4[%c0_5, %c0_6] : memref<150x300xbf16, #tpu.memory_space<vmem>>, vector<150x300xbf16>
    %c0_7 = arith.constant 0 : index
    %c0_8 = arith.constant 0 : index
    %4 = vector.load %arg5[%c0_7, %c0_8] : memref<1x300xf32, #tpu.memory_space<vmem>>, vector<1x300xf32>
    %c0_9 = arith.constant 0 : index
    %c0_10 = arith.constant 0 : index
    %5 = vector.load %arg6[%c0_9, %c0_10] : memref<300x300xbf16, #tpu.memory_space<vmem>>, vector<300x300xbf16>
    %c0_11 = arith.constant 0 : index
    %c0_12 = arith.constant 0 : index
    %6 = vector.load %arg7[%c0_11, %c0_12] : memref<1x300xf32, #tpu.memory_space<vmem>>, vector<1x300xf32>
    %c0_13 = arith.constant 0 : index
    %c0_14 = arith.constant 0 : index
    %7 = vector.load %arg8[%c0_13, %c0_14] : memref<300x150xbf16, #tpu.memory_space<vmem>>, vector<300x150xbf16>
    %c0_15 = arith.constant 0 : index
    %c0_16 = arith.constant 0 : index
    %8 = vector.load %arg9[%c0_15, %c0_16] : memref<1x150xf32, #tpu.memory_space<vmem>>, vector<1x150xf32>
    %c0_17 = arith.constant 0 : index
    %c0_18 = arith.constant 0 : index
    %9 = vector.load %arg10[%c0_17, %c0_18] : memref<150x300xbf16, #tpu.memory_space<vmem>>, vector<150x300xbf16>
    %c0_19 = arith.constant 0 : index
    %c0_20 = arith.constant 0 : index
    %10 = vector.load %arg11[%c0_19, %c0_20] : memref<1x300xf32, #tpu.memory_space<vmem>>, vector<1x300xf32>
    %c0_21 = arith.constant 0 : index
    %c0_22 = arith.constant 0 : index
    %11 = vector.load %arg12[%c0_21, %c0_22] : memref<300x300xbf16, #tpu.memory_space<vmem>>, vector<300x300xbf16>
    %c0_23 = arith.constant 0 : index
    %c0_24 = arith.constant 0 : index
    %12 = vector.load %arg13[%c0_23, %c0_24] : memref<1x300xf32, #tpu.memory_space<vmem>>, vector<1x300xf32>
    %c0_25 = arith.constant 0 : index
    %c0_26 = arith.constant 0 : index
    %13 = vector.load %arg14[%c0_25, %c0_26] : memref<300x150xbf16, #tpu.memory_space<vmem>>, vector<300x150xbf16>
    %c0_27 = arith.constant 0 : index
    %c0_28 = arith.constant 0 : index
    %14 = vector.load %arg15[%c0_27, %c0_28] : memref<1x150xf32, #tpu.memory_space<vmem>>, vector<1x150xf32>
    %c0_29 = arith.constant 0 : index
    %c0_30 = arith.constant 0 : index
    %15 = vector.load %arg16[%c0_29, %c0_30] : memref<150x7xbf16, #tpu.memory_space<vmem>>, vector<150x7xbf16>
    %c0_31 = arith.constant 0 : index
    %c0_32 = arith.constant 0 : index
    %16 = vector.load %arg17[%c0_31, %c0_32] : memref<1x7xf32, #tpu.memory_space<vmem>>, vector<1x7xf32>
    %17 = arith.truncf %0 : vector<8x42xf32> to vector<8x42xbf16>
    %cst = arith.constant dense<0.000000e+00> : vector<8x150xf32>
    %18 = tpu.matmul %17, %1, %cst {dimension_numbers = #tpu.dot_dimension_numbers<[1], [0], [0], [1], [0, 0, 1, 1], [], []>} : vector<8x42xbf16>, vector<42x150xbf16>, vector<8x150xf32> -> vector<8x150xf32>
    %19 = vector.broadcast %2 : vector<1x150xf32> to vector<8x150xf32>
    %20 = arith.addf %18, %19 : vector<8x150xf32>
    %21 = arith.negf %20 : vector<8x150xf32>
    %22 = math.exp %21 : vector<8x150xf32>
    %cst_33 = arith.constant 1.000000e+00 : f32
    %23 = vector.broadcast %cst_33 : f32 to vector<8x150xf32>
    %24 = arith.addf %23, %22 : vector<8x150xf32>
    %25 = arith.divf %23, %24 : vector<8x150xf32>
    %26 = arith.truncf %25 : vector<8x150xf32> to vector<8x150xbf16>
    %cst_34 = arith.constant dense<0.000000e+00> : vector<8x300xf32>
    %27 = tpu.matmul %26, %3, %cst_34 {dimension_numbers = #tpu.dot_dimension_numbers<[1], [0], [0], [1], [0, 0, 1, 1], [], []>} : vector<8x150xbf16>, vector<150x300xbf16>, vector<8x300xf32> -> vector<8x300xf32>
    %28 = vector.broadcast %4 : vector<1x300xf32> to vector<8x300xf32>
    %29 = arith.addf %27, %28 : vector<8x300xf32>
    %cst_35 = arith.constant 0.000000e+00 : f32
    %30 = vector.broadcast %cst_35 : f32 to vector<8x300xf32>
    %31 = arith.maximumf %29, %30 : vector<8x300xf32>
    %32 = arith.truncf %31 : vector<8x300xf32> to vector<8x300xbf16>
    %cst_36 = arith.constant dense<0.000000e+00> : vector<8x300xf32>
    %33 = tpu.matmul %32, %5, %cst_36 {dimension_numbers = #tpu.dot_dimension_numbers<[1], [0], [0], [1], [0, 0, 1, 1], [], []>} : vector<8x300xbf16>, vector<300x300xbf16>, vector<8x300xf32> -> vector<8x300xf32>
    %34 = vector.broadcast %6 : vector<1x300xf32> to vector<8x300xf32>
    %35 = arith.addf %33, %34 : vector<8x300xf32>
    %cst_37 = arith.constant 0.000000e+00 : f32
    %36 = vector.broadcast %cst_37 : f32 to vector<8x300xf32>
    %37 = arith.maximumf %35, %36 : vector<8x300xf32>
    %38 = arith.truncf %37 : vector<8x300xf32> to vector<8x300xbf16>
    %cst_38 = arith.constant dense<0.000000e+00> : vector<8x150xf32>
    %39 = tpu.matmul %38, %7, %cst_38 {dimension_numbers = #tpu.dot_dimension_numbers<[1], [0], [0], [1], [0, 0, 1, 1], [], []>} : vector<8x300xbf16>, vector<300x150xbf16>, vector<8x150xf32> -> vector<8x150xf32>
    %40 = vector.broadcast %8 : vector<1x150xf32> to vector<8x150xf32>
    %41 = arith.addf %39, %40 : vector<8x150xf32>
    %cst_39 = arith.constant 0.000000e+00 : f32
    %42 = vector.broadcast %cst_39 : f32 to vector<8x150xf32>
    %43 = arith.maximumf %41, %42 : vector<8x150xf32>
    %44 = arith.addf %25, %43 : vector<8x150xf32>
    %45 = arith.truncf %44 : vector<8x150xf32> to vector<8x150xbf16>
    %cst_40 = arith.constant dense<0.000000e+00> : vector<8x300xf32>
    %46 = tpu.matmul %45, %9, %cst_40 {dimension_numbers = #tpu.dot_dimension_numbers<[1], [0], [0], [1], [0, 0, 1, 1], [], []>} : vector<8x150xbf16>, vector<150x300xbf16>, vector<8x300xf32> -> vector<8x300xf32>
    %47 = vector.broadcast %10 : vector<1x300xf32> to vector<8x300xf32>
    %48 = arith.addf %46, %47 : vector<8x300xf32>
    %cst_41 = arith.constant 0.000000e+00 : f32
    %49 = vector.broadcast %cst_41 : f32 to vector<8x300xf32>
    %50 = arith.maximumf %48, %49 : vector<8x300xf32>
    %51 = arith.truncf %50 : vector<8x300xf32> to vector<8x300xbf16>
    %cst_42 = arith.constant dense<0.000000e+00> : vector<8x300xf32>
    %52 = tpu.matmul %51, %11, %cst_42 {dimension_numbers = #tpu.dot_dimension_numbers<[1], [0], [0], [1], [0, 0, 1, 1], [], []>} : vector<8x300xbf16>, vector<300x300xbf16>, vector<8x300xf32> -> vector<8x300xf32>
    %53 = vector.broadcast %12 : vector<1x300xf32> to vector<8x300xf32>
    %54 = arith.addf %52, %53 : vector<8x300xf32>
    %cst_43 = arith.constant 0.000000e+00 : f32
    %55 = vector.broadcast %cst_43 : f32 to vector<8x300xf32>
    %56 = arith.maximumf %54, %55 : vector<8x300xf32>
    %57 = arith.truncf %56 : vector<8x300xf32> to vector<8x300xbf16>
    %cst_44 = arith.constant dense<0.000000e+00> : vector<8x150xf32>
    %58 = tpu.matmul %57, %13, %cst_44 {dimension_numbers = #tpu.dot_dimension_numbers<[1], [0], [0], [1], [0, 0, 1, 1], [], []>} : vector<8x300xbf16>, vector<300x150xbf16>, vector<8x150xf32> -> vector<8x150xf32>
    %59 = vector.broadcast %14 : vector<1x150xf32> to vector<8x150xf32>
    %60 = arith.addf %58, %59 : vector<8x150xf32>
    %cst_45 = arith.constant 0.000000e+00 : f32
    %61 = vector.broadcast %cst_45 : f32 to vector<8x150xf32>
    %62 = arith.maximumf %60, %61 : vector<8x150xf32>
    %63 = arith.addf %44, %62 : vector<8x150xf32>
    %64 = arith.truncf %63 : vector<8x150xf32> to vector<8x150xbf16>
    %cst_46 = arith.constant dense<0.000000e+00> : vector<8x7xf32>
    %65 = tpu.matmul %64, %15, %cst_46 {dimension_numbers = #tpu.dot_dimension_numbers<[1], [0], [0], [1], [0, 0, 1, 1], [], []>} : vector<8x150xbf16>, vector<150x7xbf16>, vector<8x7xf32> -> vector<8x7xf32>
    %66 = vector.broadcast %16 : vector<1x7xf32> to vector<8x7xf32>
    %67 = arith.addf %65, %66 : vector<8x7xf32>
    %68 = arith.negf %67 : vector<8x7xf32>
    %69 = math.exp %68 : vector<8x7xf32>
    %cst_47 = arith.constant 1.000000e+00 : f32
    %70 = vector.broadcast %cst_47 : f32 to vector<8x7xf32>
    %71 = arith.addf %70, %69 : vector<8x7xf32>
    %72 = arith.divf %70, %71 : vector<8x7xf32>
    %cst_48 = arith.constant 6.000000e+00 : f32
    %73 = vector.broadcast %cst_48 : f32 to vector<8x7xf32>
    %74 = arith.mulf %72, %73 : vector<8x7xf32>
    %cst_49 = arith.constant 3.000000e+00 : f32
    %75 = vector.broadcast %cst_49 : f32 to vector<8x7xf32>
    %76 = arith.subf %74, %75 : vector<8x7xf32>
    %c0_50 = arith.constant 0 : index
    %c0_51 = arith.constant 0 : index
    %77 = vector.load %arg18[%c0_50, %c0_51] : memref<8x7xf32, #tpu.memory_space<vmem>>, vector<8x7xf32>
    tpu.vector_store %arg18[%c0_50, %c0_51], %76 {strides = array<i32>} : memref<8x7xf32, #tpu.memory_space<vmem>>, vector<8x7xf32>,
    return
  }
  func.func @transform_0(%arg0: i32) -> (i32, i32) {
    %c0_i32 = arith.constant 0 : i32
    %c0_i32_0 = arith.constant 0 : i32
    return %arg0, %c0_i32 : i32, i32
  }
  func.func @transform_1(%arg0: i32) -> (i32, i32) {
    %c0_i32 = arith.constant 0 : i32
    %c0_i32_0 = arith.constant 0 : i32
    %c0_i32_1 = arith.constant 0 : i32
    return %c0_i32, %c0_i32_0 : i32, i32
  }
  func.func @transform_2(%arg0: i32) -> (i32, i32) {
    %c0_i32 = arith.constant 0 : i32
    %c0_i32_0 = arith.constant 0 : i32
    %c0_i32_1 = arith.constant 0 : i32
    return %c0_i32, %c0_i32_0 : i32, i32
  }
  func.func @transform_3(%arg0: i32) -> (i32, i32) {
    %c0_i32 = arith.constant 0 : i32
    %c0_i32_0 = arith.constant 0 : i32
    %c0_i32_1 = arith.constant 0 : i32
    return %c0_i32, %c0_i32_0 : i32, i32
  }
  func.func @transform_4(%arg0: i32) -> (i32, i32) {
    %c0_i32 = arith.constant 0 : i32
    %c0_i32_0 = arith.constant 0 : i32
    %c0_i32_1 = arith.constant 0 : i32
    return %c0_i32, %c0_i32_0 : i32, i32
  }
  func.func @transform_5(%arg0: i32) -> (i32, i32) {
    %c0_i32 = arith.constant 0 : i32
    %c0_i32_0 = arith.constant 0 : i32
    %c0_i32_1 = arith.constant 0 : i32
    return %c0_i32, %c0_i32_0 : i32, i32
  }
  func.func @transform_6(%arg0: i32) -> (i32, i32) {
    %c0_i32 = arith.constant 0 : i32
    %c0_i32_0 = arith.constant 0 : i32
    %c0_i32_1 = arith.constant 0 : i32
    return %c0_i32, %c0_i32_0 : i32, i32
  }
  func.func @transform_7(%arg0: i32) -> (i32, i32) {
    %c0_i32 = arith.constant 0 : i32
    %c0_i32_0 = arith.constant 0 : i32
    %c0_i32_1 = arith.constant 0 : i32
    return %c0_i32, %c0_i32_0 : i32, i32
  }
  func.func @transform_8(%arg0: i32) -> (i32, i32) {
    %c0_i32 = arith.constant 0 : i32
    %c0_i32_0 = arith.constant 0 : i32
    %c0_i32_1 = arith.constant 0 : i32
    return %c0_i32, %c0_i32_0 : i32, i32
  }
  func.func @transform_9(%arg0: i32) -> (i32, i32) {
    %c0_i32 = arith.constant 0 : i32
    %c0_i32_0 = arith.constant 0 : i32
    %c0_i32_1 = arith.constant 0 : i32
    return %c0_i32, %c0_i32_0 : i32, i32
  }
  func.func @transform_10(%arg0: i32) -> (i32, i32) {
    %c0_i32 = arith.constant 0 : i32
    %c0_i32_0 = arith.constant 0 : i32
    %c0_i32_1 = arith.constant 0 : i32
    return %c0_i32, %c0_i32_0 : i32, i32
  }
  func.func @transform_11(%arg0: i32) -> (i32, i32) {
    %c0_i32 = arith.constant 0 : i32
    %c0_i32_0 = arith.constant 0 : i32
    %c0_i32_1 = arith.constant 0 : i32
    return %c0_i32, %c0_i32_0 : i32, i32
  }
  func.func @transform_12(%arg0: i32) -> (i32, i32) {
    %c0_i32 = arith.constant 0 : i32
    %c0_i32_0 = arith.constant 0 : i32
    %c0_i32_1 = arith.constant 0 : i32
    return %c0_i32, %c0_i32_0 : i32, i32
  }
  func.func @transform_13(%arg0: i32) -> (i32, i32) {
    %c0_i32 = arith.constant 0 : i32
    %c0_i32_0 = arith.constant 0 : i32
    %c0_i32_1 = arith.constant 0 : i32
    return %c0_i32, %c0_i32_0 : i32, i32
  }
  func.func @transform_14(%arg0: i32) -> (i32, i32) {
    %c0_i32 = arith.constant 0 : i32
    %c0_i32_0 = arith.constant 0 : i32
    %c0_i32_1 = arith.constant 0 : i32
    return %c0_i32, %c0_i32_0 : i32, i32
  }
  func.func @transform_15(%arg0: i32) -> (i32, i32) {
    %c0_i32 = arith.constant 0 : i32
    %c0_i32_0 = arith.constant 0 : i32
    %c0_i32_1 = arith.constant 0 : i32
    return %c0_i32, %c0_i32_0 : i32, i32
  }
  func.func @transform_16(%arg0: i32) -> (i32, i32) {
    %c0_i32 = arith.constant 0 : i32
    %c0_i32_0 = arith.constant 0 : i32
    %c0_i32_1 = arith.constant 0 : i32
    return %c0_i32, %c0_i32_0 : i32, i32
  }
  func.func @transform_17(%arg0: i32) -> (i32, i32) {
    %c0_i32 = arith.constant 0 : i32
    %c0_i32_0 = arith.constant 0 : i32
    return %arg0, %c0_i32 : i32, i32
  }
}

</mosaic_0001>

<bundles_post_ra>
// kernel: tpu_custom_call.1
= control target key start
LH: loop header
LB: loop body
LE: loop exit
PB: predicated region body
PF: predicated region fallthrough
CT: control target
= control target key end

     0   :  { %s4653_s0 = inlined_call_operand.vmem [shape: f32[8,42], index: 0, kind: input, shape index: {}]   ;;  %s4654_s1 = inlined_call_operand.hbm [shape: bf16[42,150], index: 1, kind: input, shape index: {}]   ;;  %s4655_s2 = inlined_call_operand.hbm [shape: f32[1,150], index: 2, kind: input, shape index: {}]   ;;  %s4656_s3 = inlined_call_operand.vmem [shape: bf16[150,300], index: 3, kind: input, shape index: {}]   ;;  %s4657_s4 = inlined_call_operand.vmem [shape: f32[1,300], index: 4, kind: input, shape index: {}]   ;;  %s4658_s5 = inlined_call_operand.vmem [shape: bf16[300,300], index: 5, kind: input, shape index: {}]   ;;  %s4659_s6 = inlined_call_operand.vmem [shape: f32[1,300], index: 6, kind: input, shape index: {}]   ;;  %s4660_s7 = inlined_call_operand.vmem [shape: bf16[300,150], index: 7, kind: input, shape index: {}]   ;;  %s4661_s8 = inlined_call_operand.vmem [shape: f32[1,150], index: 8, kind: input, shape index: {}]   ;;  %s4662_s9 = inlined_call_operand.hbm [shape: bf16[150,300], index: 9, kind: input, shape index: {}]   ;;  %s4663_s10 = inlined_call_operand.vmem [shape: f32[1,300], index: 10, kind: input, shape index: {}]   ;;  %s4664_s11 = inlined_call_operand.vmem [shape: bf16[300,300], index: 11, kind: input, shape index: {}]   ;;  %s4665_s12 = inlined_call_operand.vmem [shape: f32[1,300], index: 12, kind: input, shape index: {}]   ;;  %s4666_s13 = inlined_call_operand.vmem [shape: bf16[300,150], index: 13, kind: input, shape index: {}]   ;;  %s4667_s14 = inlined_call_operand.vmem [shape: f32[1,150], index: 14, kind: input, shape index: {}]   ;;  %s4668_s15 = inlined_call_operand.vmem [shape: bf16[150,7], index: 15, kind: input, shape index: {}]   ;;  %s4669_s16 = inlined_call_operand.vmem [shape: f32[1,7], index: 16, kind: input, shape index: {}]   ;;  %s4670_s17 = inlined_call_operand.hbm [shape: f32[8,7], index: 17, kind: output, shape index: {}]  }
   0x1   :  { %4672 = sst [smem:[#allocation12_spill]] %s4653_s0 }
   0x2   :  { %4673 = sst [smem:[#allocation13_spill]] %s4654_s1 }
   0x3   :  { %22 = vsyncpa [#allocation3], 0 }
   0x4   :  { %23 = vsyncpa [#allocation6], 0 }
   0x5   :  { %24 = vsyncpa [#allocation4], 0  ;;  %s3664_s24 = smov [#allocation5]   ;;  %s3665_s26 = smov [#allocation2]  }
   0x6   :  { %s45_s25 = sshll.u32 %s3664_s24, 4  ;;  %s32_s27 = sshll.u32 %s3665_s26, 4  ;;  %s46_s25 = int_to_ptr.vmem [resolvable:$true] %s45_s25  ;;  %s3765_s27 = int_to_ptr.vmem [resolvable:$true] %s32_s27 }
   0x7   :  { %s3570_s0 = scalar_lea.hbm %s4655_s2, 32 }
   0x8   :  { %p3571_p0 = scmp.ne.s32.totalorder %s4655_s2, %s3570_s0  ;;  %p3574_p1 = scmp.lt.u32.totalorder %s3570_s0, %s4655_s2 }
   0xa   :  { %p3576_p2 = pnand %p3574_p1, %p3571_p0 }
   0xc   :  { %3579 = shalt.err (!%p3576_p2)
}
   0xd   :  { %s3580_s20 = scalar_lea.vmem %s46_s25, 32  ;;  %p3585_p4 = scmp.lt.s32.totalorder %s46_s25, %s46_s25 }
   0xe   :  { %p3581_p3 = scmp.ne.s32.totalorder %s46_s25, %s3580_s20  ;;  %p3586_p5 = scmp.lt.s32.totalorder %s3580_s20, %s3580_s20 }
  0x10   :  { %p3587_p6 = por %p3586_p5, %p3585_p4 }
  0x12   :  { %p3588_p7 = pnand %p3587_p6, %p3581_p3 }
  0x14   :  { %3591 = shalt.err (!%p3588_p7)
}
  0x15   :  { %48 = dma.hbm_to_vmem [thread:$0]  %s4655_s2, 32, %s46_s25, [#allocation6]  }
  0x16   :  { %s4674_s26 = sld [smem:[#allocation13_spill]] }
  0x1c   :  { %s3592_s28 = scalar_lea.hbm %s4674_s26, 768 }
  0x1d   :  { %p3593_p8 = scmp.ne.s32.totalorder %s4674_s26, %s3592_s28  ;;  %p3596_p9 = scmp.lt.u32.totalorder %s3592_s28, %s4674_s26 }
  0x1f   :  { %p3598_p10 = pnand %p3596_p9, %p3593_p8 }
  0x21   :  { %3601 = shalt.err (!%p3598_p10)
}
  0x22   :  { %s3602_s19 = scalar_lea.vmem %s3765_s27, 768  ;;  %p3607_p12 = scmp.lt.s32.totalorder %s3765_s27, %s3765_s27 }
  0x23   :  { %p3603_p11 = scmp.ne.s32.totalorder %s3765_s27, %s3602_s19  ;;  %p3608_p13 = scmp.lt.s32.totalorder %s3602_s19, %s3602_s19 }
  0x25   :  { %p3609_p0 = por %p3608_p13, %p3607_p12 }
  0x27   :  { %p3610_p1 = pnand %p3609_p0, %p3603_p11 }
  0x29   :  { %3613 = shalt.err (!%p3610_p1)
}
  0x2a   :  { %s3666_s2 = smov 128   ;;  %s3667_s25 = smov 8  }
  0x2b   :  { %38 = dma.hbm_to_vmem [thread:$0]  %s4674_s26, 768, %s3765_s27, [#allocation3], %s3666_s2, %s3666_s2, %s3667_s25  }
  0x2c   :  { %s3668_s21 = smov [#allocation7]   ;;  %s3614_s28 = scalar_lea.hbm %s4662_s9, 3648 }
  0x2d   :  { %s66_s22 = sshll.u32 %s3668_s21, 4  ;;  %p3615_p2 = scmp.ne.s32.totalorder %s4662_s9, %s3614_s28  ;;  %s67_s22 = int_to_ptr.vmem [resolvable:$true] %s66_s22 }
  0x2e   :  { %p3618_p3 = scmp.lt.u32.totalorder %s3614_s28, %s4662_s9 }
  0x30   :  { %p3620_p4 = pnand %p3618_p3, %p3615_p2 }
  0x32   :  { %3623 = shalt.err (!%p3620_p4)
}
  0x33   :  { %s3624_s19 = scalar_lea.vmem %s67_s22, 3648  ;;  %p3629_p6 = scmp.lt.s32.totalorder %s67_s22, %s67_s22 }
  0x34   :  { %p3625_p5 = scmp.ne.s32.totalorder %s67_s22, %s3624_s19  ;;  %p3630_p7 = scmp.lt.s32.totalorder %s3624_s19, %s3624_s19 }
  0x36   :  { %p3631_p8 = por %p3630_p7, %p3629_p6 }
  0x38   :  { %p3632_p9 = pnand %p3631_p8, %p3625_p5 }
  0x3a   :  { %3635 = shalt.err (!%p3632_p9)
}
  0x3b   :  { %s3669_s27 = smov 192   ;;  %s3670_s26 = smov 12  }
  0x3c   :  { %72 = dma.hbm_to_vmem [thread:$0]  %s4662_s9, 3648, %s67_s22, [#allocation6], %s3669_s27, %s3669_s27, %s3670_s26  }
  0x3d   :  { %3658 = dma.done.wait [#allocation3], 768  }
  0x3e   :  { %3659 = vsyncadd [#allocation3], 4294966528 }
  0x3f   :  { %3660 = dma.done.wait [#allocation6], 3680  }
  0x40   :  { %3661 = vsyncadd [#allocation6], 4294963616  ;;  %v3671_v0 = vmov 0   ;;  %v3195_v1 = vld [vmem:[#allocation2 + $0x4] ss:$8 sps:$4 sm:$0xff]   ;;  %vm479_vm0 = vcmask 1044480   ;;  %v437_v45 = vlaneseq }
  0x41   :  { %518 = vmatprep.mubr.bf16.mxu0 %v3671_v0  ;;  %v3197_v2 = vld [vmem:[#allocation2] ss:$8 sps:$4 sm:$0xff]   ;;  %486 = vmatprep.subr.bf16.mxu0 %v3195_v1  ;;  %v3198_v3 = vld [vmem:[#allocation2 + $0x14] ss:$8 sps:$4 sm:$0xff]   ;;  %v3200_v4 = vld [vmem:[#allocation2 + $0x10] ss:$8 sps:$4 sm:$0xff]  }
  0x42   :  { %487 = vmatpush1.bf16.msra.mxu0 %v3197_v2  ;;  %v3201_v5 = vld [vmem:[#allocation2 + $0x24] ss:$8 sps:$4 sm:$0x1f]   ;;  %v3203_v6 = vld [vmem:[#allocation2 + $0x20] ss:$8 sps:$4 sm:$0x1f]  }
  0x43   :  { %488 = vmatprep.subr.bf16.mxu0 %v3198_v3  ;;  %v3204_v7 = vld [vmem:[%s4656_s3 + $0x4] ss:$12 sps:$4 sm:$0xff]   ;;  %v3206_v8 = vld [vmem:[%s4656_s3] ss:$12 sps:$4 sm:$0xff]   ;;  %v481_v9 = vsel %vm479_vm0, %v3203_v6, 0  ;;  %s4675_s24 = sld [smem:[#allocation12_spill]] }
  0x44   :  { %723 = vmatprep.subr.bf16.mxu1 %v3204_v7  ;;  %v3208_v11 = vld [vmem:[%s4656_s3 + $0x1c] ss:$12 sps:$4 sm:$0xff]   ;;  %v3210_v12 = vld [vmem:[%s4656_s3 + $0x18] ss:$12 sps:$4 sm:$0xff]   ;;  %vm475_vm1 = vcmask 343040   ;;  %vm713_vm2 = vcmask 1042432  }
  0x45   :  { %724 = vmatpush1.bf16.msra.mxu1 %v3206_v8  ;;  %v3207_v13 = vld [vmem:[%s4656_s3 + $0x8] ss:$12 sps:$4 sm:$0xff]   ;;  %v3211_v15 = vld [vmem:[%s4656_s3 + $0x20] ss:$12 sps:$4 sm:$0xff]   ;;  %v3214_v17 = vld [vmem:[%s4656_s3 + $0x30] ss:$12 sps:$4 sm:$0xff]  }
  0x46   :  { %489 = vmatpush1.bf16.msra.mxu0 %v3200_v4  ;;  %725 = vmatprep.subr.bf16.mxu1 %v3208_v11  ;;  %v3212_v16 = vld [vmem:[%s4656_s3 + $0x34] ss:$12 sps:$4 sm:$0xff]   ;;  %v3215_v18 = vld [vmem:[%s4656_s3 + $0x38] ss:$12 sps:$4 sm:$0xff]   ;;  %v3219_v21 = vld [vmem:[%s4656_s3 + $0x50] ss:$12 sps:$4 sm:$0xff]  }
  0x47   :  { %2806 = vmatprep.subr.msk.bf16.mxu0 %vm479_vm0, %v3201_v5  ;;  %v3216_v19 = vld [vmem:[%s4656_s3 + $0x4c] ss:$12 sps:$4 sm:$0xff]   ;;  %v3218_v20 = vld [vmem:[%s4656_s3 + $0x48] ss:$12 sps:$4 sm:$0xff]   ;;  %v3220_v22 = vld [vmem:[%s4656_s3 + $0x64] ss:$12 sps:$4 sm:$0xff]  }
  0x48   :  { %v3222_v23 = vld [vmem:[%s4656_s3 + $0x60] ss:$12 sps:$4 sm:$0xff]   ;;  %v3223_v24 = vld [vmem:[%s4656_s3 + $0x68] ss:$12 sps:$4 sm:$0xff]   ;;  %v3226_v26 = vld [vmem:[%s4656_s3 + $0x78] ss:$12 sps:$4 sm:$0xff]  }
  0x49   :  { %v97_v10 = vld [vmem:[%s4675_s24] sm:$0xff]  ;;  %726 = vmatpush1.bf16.msra.mxu1 %v3210_v12  ;;  %v3224_v25 = vld [vmem:[%s4656_s3 + $0x7c] ss:$12 sps:$4 sm:$0xff]   ;;  %v3232_v31 = vld [vmem:[%s4656_s3 + $0xac] ss:$12 sps:$4 sm:$0xff]   ;;  %v3918_v46 = vshrl.u32 %v437_v45, 7 }
  0x4a   :  { %v435_v14 = vpack.c.bf16 %v97_v10, %v97_v10  ;;  %491 = vmatpush1.bf16.msra.mxu0 %v481_v9  ;;  %727 = vmatprep.subr.bf16.mxu1 %v3212_v16  ;;  %v3227_v27 = vld [vmem:[%s4656_s3 + $0x80] ss:$12 sps:$4 sm:$0xff]   ;;  %v3230_v29 = vld [vmem:[%s4656_s3 + $0x90] ss:$12 sps:$4 sm:$0xff]   ;;  %v3231_v30 = vld [vmem:[%s4656_s3 + $0x98] ss:$12 sps:$4 sm:$0xff]  }
  0x4b   :  { %764 = vmatprep.subr.bf16.mxu0 %v3671_v0  ;;  %v3228_v28 = vld [vmem:[%s4656_s3 + $0x94] ss:$12 sps:$4 sm:$0xff]   ;;  %v3235_v33 = vld [vmem:[%s4656_s3 + $0xb0] ss:$12 sps:$4 sm:$0xff]   ;;  %v3921_v47 = vsub.s32 0, %v3918_v46  ;;  %v3924_v49 = vsub.s32 1, %v3918_v46 }
  0x4c   :  { %v3234_v32 = vld [vmem:[%s4656_s3 + $0xa8] ss:$12 sps:$4 sm:$0xff]   ;;  %v3236_v34 = vld [vmem:[%s4656_s3 + $0xc4] ss:$12 sps:$4 sm:$0xff]   ;;  %v3238_v35 = vld [vmem:[%s4656_s3 + $0xc0] ss:$12 sps:$4 sm:$0xff]  }
  0x4d   :  { %2807 = vmatmul.mubr.msk.bf16.vlgmr.msra.gmra.mrb[0].mxu0 %vm475_vm1, %v435_v14  ;;  %728 = vmatpush1.bf16.msra.mxu1 %v3214_v17  ;;  %v3239_v36 = vld [vmem:[%s4656_s3 + $0xc8] ss:$12 sps:$4 sm:$0xff]   ;;  %v141_v37 = vld [vmem:[%s4656_s3 + $0xd8] sm:$0x77]  ;;  %v3245_v43 = vld [vmem:[%s4658_s5 + $0x4] ss:$12 sps:$4 sm:$0xff]  }
  0x4e   :  { %765 = vmatpush1.bf16.msra.mxu0 %v3207_v13  ;;  %729 = vmatprep.subr.bf16.mxu1 %v3216_v19  ;;  %v3242_v38 = vld [vmem:[%s4656_s3 + $0xe0] ss:$0 sps:$4 sm:$0x77]   ;;  %v2838_v39 = vcombine.high %v141_v37, %v141_v37  ;;  %v2837_v40 = vcombine.low %v141_v37, %v141_v37  ;;  %v3284_v44 = vld [vmem:[%s4658_s5 + $0x184] ss:$12 sps:$4 sm:$0xff]   ;;  %vm709_vm3 = vcmask 179200  }
  0x4f   :  { %766 = vmatprep.subr.bf16.mxu0 %v3671_v0  ;;  %v721_v42 = vsel %vm713_vm2, %v3242_v38, 0  ;;  %v104_v48 = vld [vmem:[#allocation5] sm:$0x3]  ;;  %v3243_v4 = vld [vmem:[%s4658_s5] ss:$12 sps:$4 sm:$0xff]   ;;  %vm1131_vm4 = vcmask 1045504  }
  0x50   :  { %v715_v41 = vsel %vm713_vm2, %v2837_v40, 0  ;;  %v440_v50 = vrot.slane %v104_v48, %v3921_v47  ;;  %v444_v51 = vrot.slane %v104_v48, %v3924_v49  ;;  %v3282_v5 = vld [vmem:[%s4658_s5 + $0x180] ss:$12 sps:$4 sm:$0xff]   ;;  %v3248_v7 = vld [vmem:[%s4658_s5 + $0x1c] ss:$12 sps:$4 sm:$0xff]   ;;  %vm1127_vm5 = vcmask 359424  }
  0x51   :  { %730 = vmatpush1.bf16.msra.mxu1 %v3218_v20  ;;  %v3290_v8 = vld [vmem:[%s4658_s5 + $0x19c] ss:$12 sps:$4 sm:$0xff]   ;;  %v3246_v9 = vld [vmem:[%s4658_s5 + $0x18] ss:$12 sps:$4 sm:$0xff]   ;;  %v3251_v11 = vld [vmem:[%s4658_s5 + $0x34] ss:$12 sps:$4 sm:$0xff]  }
  0x52   :  { %767 = vmatpush1.bf16.msra.mxu0 %v3211_v15  ;;  %731 = vmatprep.subr.bf16.mxu1 %v3220_v22  ;;  %v3288_v10 = vld [vmem:[%s4658_s5 + $0x198] ss:$12 sps:$4 sm:$0xff]   ;;  %v3249_v12 = vld [vmem:[%s4658_s5 + $0x30] ss:$12 sps:$4 sm:$0xff]   ;;  %v3252_v14 = vld [vmem:[%s4658_s5 + $0x48] ss:$12 sps:$4 sm:$0xff]  }
  0x53   :  { %768 = vmatprep.subr.bf16.mxu0 %v3671_v0  ;;  %v3254_v13 = vld [vmem:[%s4658_s5 + $0x4c] ss:$12 sps:$4 sm:$0xff]   ;;  %v3257_v15 = vld [vmem:[%s4658_s5 + $0x64] ss:$12 sps:$4 sm:$0xff]   ;;  %v3260_v17 = vld [vmem:[%s4658_s5 + $0x7c] ss:$12 sps:$4 sm:$0xff]  }
  0x54   :  { %v3255_v16 = vld [vmem:[%s4658_s5 + $0x60] ss:$12 sps:$4 sm:$0xff]   ;;  %v3261_v20 = vld [vmem:[%s4658_s5 + $0x90] ss:$12 sps:$4 sm:$0xff]   ;;  %v3264_v22 = vld [vmem:[%s4658_s5 + $0xa8] ss:$12 sps:$4 sm:$0xff]  }
  0x55   :  { %732 = vmatpush1.bf16.msra.mxu1 %v3222_v23  ;;  %v3263_v19 = vld [vmem:[%s4658_s5 + $0x94] ss:$12 sps:$4 sm:$0xff]   ;;  %v3269_v23 = vld [vmem:[%s4658_s5 + $0xc4] ss:$12 sps:$4 sm:$0xff]   ;;  %v3299_v40 = vld [vmem:[%s4658_s5 + $0x16c] ss:$12 sps:$4 sm:$0xff]  }
  0x56   :  { %769 = vmatpush1.bf16.msra.mxu0 %v3215_v18  ;;  %733 = vmatprep.subr.bf16.mxu1 %v3224_v25  ;;  %v3258_v18 = vld [vmem:[%s4658_s5 + $0x78] ss:$12 sps:$4 sm:$0xff]   ;;  %v3272_v25 = vld [vmem:[%s4658_s5 + $0xdc] ss:$12 sps:$4 sm:$0xff]   ;;  %vm3673_vm6 = vmmov 0   ;;  %s3674_s27 = smov [#allocation8]  }
  0x57   :  { %770 = vmatprep.subr.bf16.mxu0 %v3671_v0  ;;  %v3294_v37 = vld [vmem:[%s4658_s5 + $0x1b4] ss:$12 sps:$4 sm:$0x3f]   ;;  %v3296_v38 = vld [vmem:[%s4658_s5 + $0x1b0] ss:$12 sps:$4 sm:$0x3f]  }
  0x58   :  { %s2790_s26 = sshll.u32 %s3674_s27, 4  ;;  %vm2782_vm7 = vcmask 56320   ;;  %s2791_s26 = int_to_ptr.vmem [resolvable:$true] %s2790_s26 }
  0x59   :  { %734 = vmatpush1.bf16.msra.mxu1 %v3226_v26  ;;  %v3270_v26 = vld [vmem:[%s4658_s5 + $0xd8] ss:$12 sps:$4 sm:$0xff]   ;;  %s3636_s2 = scalar_lea.vmem %s2791_s26, 128  ;;  %p3641_p11 = scmp.lt.s32.totalorder %s2791_s26, %s2791_s26 }
  0x5a   :  { %771 = vmatpush1.bf16.msra.mxu0 %v3219_v21  ;;  %735 = vmatprep.subr.bf16.mxu1 %v3228_v28  ;;  %v3266_v21 = vld [vmem:[%s4658_s5 + $0xac] ss:$12 sps:$4 sm:$0xff]   ;;  %v3273_v28 = vld [vmem:[%s4658_s5 + $0xf0] ss:$12 sps:$4 sm:$0xff]   ;;  %p3637_p10 = scmp.ne.s32.totalorder %s2791_s26, %s3636_s2  ;;  %p3642_p12 = scmp.lt.s32.totalorder %s3636_s2, %s3636_s2 }
  0x5b   :  { %772 = vmatprep.subr.bf16.mxu0 %v3671_v0 }
  0x5c   :  { %p3643_p13 = por %p3642_p12, %p3641_p11 }
  0x5d   :  { %736 = vmatpush1.bf16.msra.mxu1 %v3230_v29  ;;  %v3278_v29 = vld [vmem:[%s4658_s5 + $0x10c] ss:$12 sps:$4 sm:$0xff]  }
  0x5e   :  { %773 = vmatpush1.bf16.msra.mxu0 %v3223_v24  ;;  %737 = vmatprep.subr.bf16.mxu1 %v3232_v31  ;;  %v3267_v24 = vld [vmem:[%s4658_s5 + $0xc0] ss:$12 sps:$4 sm:$0xff]   ;;  %v3281_v31 = vld [vmem:[%s4658_s5 + $0x124] ss:$12 sps:$4 sm:$0xff]   ;;  %p3644_p0 = pnand %p3643_p13, %p3637_p10 }
  0x5f   :  { %774 = vmatprep.subr.bf16.mxu0 %v3671_v0 }
  0x61   :  { %738 = vmatpush1.bf16.msra.mxu1 %v3234_v32  ;;  %v3279_v32 = vld [vmem:[%s4658_s5 + $0x120] ss:$12 sps:$4 sm:$0xff]  }
  0x62   :  { %775 = vmatpush1.bf16.msra.mxu0 %v3227_v27  ;;  %739 = vmatprep.subr.bf16.mxu1 %v3236_v34  ;;  %v3275_v27 = vld [vmem:[%s4658_s5 + $0xf4] ss:$12 sps:$4 sm:$0xff]   ;;  %v3285_v34 = vld [vmem:[%s4658_s5 + $0x138] ss:$12 sps:$4 sm:$0xff]  }
  0x63   :  { %776 = vmatprep.subr.bf16.mxu0 %v3671_v0 }
  0x65   :  { %740 = vmatpush1.bf16.msra.mxu1 %v3238_v35  ;;  %v3293_v35 = vld [vmem:[%s4658_s5 + $0x154] ss:$12 sps:$4 sm:$0xff]  }
  0x66   :  { %777 = vmatpush1.bf16.msra.mxu0 %v3231_v30  ;;  %2840 = vmatprep.subr.msk.bf16.mxu1 %vm713_vm2, %v2838_v39  ;;  %v3276_v30 = vld [vmem:[%s4658_s5 + $0x108] ss:$12 sps:$4 sm:$0xff]   ;;  %v1133_v39 = vsel %vm1131_vm4, %v3296_v38, 0  ;;  %v3339_v38 = vld [vmem:[%s4660_s7 + $0x64] ss:$8 sps:$4 sm:$0xff]  }
  0x67   :  { %778 = vmatprep.subr.bf16.mxu0 %v3671_v0 }
  0x69   :  { %742 = vmatpush1.bf16.msra.mxu1 %v715_v41  ;;  %v3297_v41 = vld [vmem:[%s4658_s5 + $0x168] ss:$12 sps:$4 sm:$0xff]  }
  0x6a   :  { %779 = vmatpush1.bf16.msra.mxu0 %v3235_v33  ;;  %1141 = vmatprep.subr.bf16.mxu1 %v3245_v43  ;;  %v3287_v33 = vld [vmem:[%s4658_s5 + $0x13c] ss:$12 sps:$4 sm:$0xff]   ;;  %v4053_v43 = vsub.s32 2, %v3918_v46 }
  0x6b   :  { %780 = vmatprep.subr.bf16.mxu0 %v3671_v0 }
  0x6e   :  { %781 = vmatpush1.bf16.msra.mxu0 %v3239_v36  ;;  %v3291_v36 = vld [vmem:[%s4658_s5 + $0x150] ss:$12 sps:$4 sm:$0xff]  }
  0x6f   :  { %782 = vmatprep.subr.bf16.mxu0 %v3671_v0 }
  0x72   :  { %783 = vmatpush1.bf16.msra.mxu0 %v721_v42  ;;  %v3300_v42 = vld [vmem:[%s4658_s5 + $0xc8] ss:$12 sps:$4 sm:$0xff]  }
  0x73   :  { %1182 = vmatprep.subr.bf16.mxu0 %v3284_v44  ;;  %v143_v44 = vld [vmem:[%s4657_s4] sm:$0x7] }
  0x74   :  { %v545_v45 = vrot.slane %v143_v44, %v3921_v47  ;;  %v553_v48 = vrot.slane %v143_v44, %v4053_v43 }
 0x120   :  { %v520_v52 = vpop.f32.mrb[0].mxu0 }
 0x121   :  { %v521_v53 = vadd.f32 %v520_v52, %v440_v50  ;;  %v522_v54 = vpop.f32.mrb[1].mxu0  ;;  %v549_v50 = vrot.slane %v143_v44, %v3924_v49  ;;  %v3343_v44 = vld [vmem:[%s4660_s7 + $0x80] ss:$8 sps:$4 sm:$0xff]  }
 0x122   :  { %v523_v55 = vadd.f32 %v522_v54, %v444_v51  ;;  %v524_v56 = vpop.f32.mrb[2].mxu0 }
 0x123   :  { %v2808_v57 = vmul.f32 -1.442695, %v521_v53  ;;  %v525_v58 = vpop.f32.mrb[3].mxu0 }
 0x124   :  { %v2809_v59 = vmul.f32 -1.442695, %v523_v55 }
 0x125   :  { %3558 = vpow2.f32 %v2808_v57 }
 0x126   :  { %3560 = vpow2.f32 %v2809_v59 }
 0x12f   :  { %v3559_v60 = vpop.eup %3558 }
 0x130   :  { %v3561_v61 = vpop.eup %3560  ;;  %v533_v62 = vadd.f32 1.0, %v3559_v60 }
 0x131   :  { %v534_v63 = vadd.f32 1.0, %v3561_v61 }
 0x132   :  { %3562 = vrcp.f32 %v533_v62 }
 0x133   :  { %3564 = vrcp.f32 %v534_v63 }
 0x13c   :  { %v3928_v1 = vpop.eup %3562 }
 0x13d   :  { %v3930_v2 = vpop.eup %3564  ;;  %v539_v6 = vpack.c.bf16 %v3928_v1, %v3928_v1 }
 0x13e   :  { %v540_v3 = vpack.c.bf16 %v3930_v2, %v3930_v2 }
 0x140   :  { %2841 = vmatprep.mubr.msk.bf16.mxu1 %vm709_vm3, %v540_v3  ;;  %2842 = vmatprep.mubr.msk.bf16.mxu0 %vm709_vm3, %v540_v3  ;;  %v3301_v3 = vld [vmem:[%s4658_s5 + $0x8] ss:$12 sps:$4 sm:$0xff]  }
 0x141   :  { %756 = vmatmul.mubr.bf16.vlgmr.msra.gmra.mrb[0].mxu1 %v539_v6  ;;  %797 = vmatmul.mubr.bf16.vlgmr.msra.gmra.mrb[4].mxu0 %v539_v6  ;;  %v3302_v6 = vld [vmem:[%s4658_s5 + $0xe0] ss:$12 sps:$4 sm:$0xff]  }
 0x142   :  { %1142 = vmatpush1.bf16.msra.mxu1 %v3243_v4  ;;  %1183 = vmatpush1.bf16.msra.mxu0 %v3282_v5 }
 0x143   :  { %1143 = vmatprep.subr.bf16.mxu1 %v3248_v7  ;;  %1184 = vmatprep.subr.bf16.mxu0 %v3290_v8  ;;  %v3303_v8 = vld [vmem:[%s4658_s5 + $0x20] ss:$12 sps:$4 sm:$0xff]  }
 0x144   :  { %1214 = vmatprep.mubr.bf16.mxu0 %v3671_v0 }
 0x146   :  { %1144 = vmatpush1.bf16.msra.mxu1 %v3246_v9  ;;  %1185 = vmatpush1.bf16.msra.mxu0 %v3288_v10  ;;  %v3304_v9 = vld [vmem:[%s4658_s5 + $0xf8] ss:$12 sps:$4 sm:$0xff]  }
 0x147   :  { %1145 = vmatprep.subr.bf16.mxu1 %v3251_v11  ;;  %2900 = vmatprep.subr.msk.bf16.mxu0 %vm1131_vm4, %v3294_v37  ;;  %v3305_v10 = vld [vmem:[%s4658_s5 + $0x38] ss:$12 sps:$4 sm:$0xff]   ;;  %v3306_v11 = vld [vmem:[%s4658_s5 + $0x110] ss:$12 sps:$4 sm:$0xff]  }
 0x148   :  { %v3334_v37 = vld [vmem:[%s4660_s7 + $0x50] ss:$8 sps:$4 sm:$0xff]  }
 0x14a   :  { %1146 = vmatpush1.bf16.msra.mxu1 %v3249_v12  ;;  %1187 = vmatpush1.bf16.msra.mxu0 %v1133_v39  ;;  %v3307_v12 = vld [vmem:[%s4658_s5 + $0x50] ss:$12 sps:$4 sm:$0xff]   ;;  %v3337_v39 = vld [vmem:[%s4660_s7 + $0x60] ss:$8 sps:$4 sm:$0xff]  }
 0x14b   :  { %1147 = vmatprep.subr.bf16.mxu1 %v3254_v13  ;;  %3090 = vmatprep.subr.bf16.mxu0 %v3300_v42  ;;  %v3308_v13 = vld [vmem:[%s4658_s5 + $0x128] ss:$12 sps:$4 sm:$0xff]   ;;  %v3345_v42 = vld [vmem:[%s4660_s7 + $0x84] ss:$8 sps:$4 sm:$0xff]  }
 0x14e   :  { %1148 = vmatpush1.bf16.msra.mxu1 %v3252_v14  ;;  %v3309_v14 = vld [vmem:[%s4658_s5 + $0x68] ss:$12 sps:$4 sm:$0xff]  }
 0x14f   :  { %1149 = vmatprep.subr.bf16.mxu1 %v3257_v15  ;;  %v3310_v15 = vld [vmem:[%s4658_s5 + $0x140] ss:$12 sps:$4 sm:$0xff]  }
 0x152   :  { %1150 = vmatpush1.bf16.msra.mxu1 %v3255_v16  ;;  %v3311_v16 = vld [vmem:[%s4658_s5 + $0x80] ss:$12 sps:$4 sm:$0xff]  }
 0x153   :  { %1151 = vmatprep.subr.bf16.mxu1 %v3260_v17  ;;  %v3312_v17 = vld [vmem:[%s4658_s5 + $0x158] ss:$12 sps:$4 sm:$0xff]  }
 0x156   :  { %1152 = vmatpush1.bf16.msra.mxu1 %v3258_v18  ;;  %v3313_v18 = vld [vmem:[%s4658_s5 + $0x98] ss:$12 sps:$4 sm:$0xff]  }
 0x157   :  { %1153 = vmatprep.subr.bf16.mxu1 %v3263_v19  ;;  %v3314_v19 = vld [vmem:[%s4658_s5 + $0x170] ss:$12 sps:$4 sm:$0xff]  }
 0x15a   :  { %1154 = vmatpush1.bf16.msra.mxu1 %v3261_v20  ;;  %v3315_v20 = vld [vmem:[%s4658_s5 + $0xb0] ss:$12 sps:$4 sm:$0xff]  }
 0x15b   :  { %1155 = vmatprep.subr.bf16.mxu1 %v3266_v21  ;;  %v3316_v21 = vld [vmem:[%s4658_s5 + $0x188] ss:$12 sps:$4 sm:$0xff]  }
 0x15e   :  { %1156 = vmatpush1.bf16.msra.mxu1 %v3264_v22  ;;  %v3672_v22 = vmov 0.0  }
 0x15f   :  { %1157 = vmatprep.subr.bf16.mxu1 %v3269_v23  ;;  %v3317_v23 = vld [vmem:[%s4658_s5 + $0x1a0] ss:$12 sps:$4 sm:$0xff]  }
 0x162   :  { %1158 = vmatpush1.bf16.msra.mxu1 %v3267_v24  ;;  %v3318_v24 = vld [vmem:[%s4658_s5 + $0x1b8] ss:$12 sps:$4 sm:$0x3f]  }
 0x163   :  { %1159 = vmatprep.subr.bf16.mxu1 %v3272_v25  ;;  %v1139_v25 = vsel %vm1131_vm4, %v3318_v24, 0 }
 0x166   :  { %1160 = vmatpush1.bf16.msra.mxu1 %v3270_v26  ;;  %v3321_v26 = vld [vmem:[%s4660_s7 + $0x4] ss:$8 sps:$4 sm:$0xff]  }
 0x167   :  { %1161 = vmatprep.subr.bf16.mxu1 %v3275_v27  ;;  %v3319_v27 = vld [vmem:[%s4660_s7] ss:$8 sps:$4 sm:$0xff]  }
 0x16a   :  { %1162 = vmatpush1.bf16.msra.mxu1 %v3273_v28  ;;  %v3324_v28 = vld [vmem:[%s4660_s7 + $0x14] ss:$8 sps:$4 sm:$0xff]  }
 0x16b   :  { %1163 = vmatprep.subr.bf16.mxu1 %v3278_v29  ;;  %v3322_v29 = vld [vmem:[%s4660_s7 + $0x10] ss:$8 sps:$4 sm:$0xff]  }
 0x16e   :  { %1164 = vmatpush1.bf16.msra.mxu1 %v3276_v30  ;;  %v3327_v30 = vld [vmem:[%s4660_s7 + $0x24] ss:$8 sps:$4 sm:$0xff]  }
 0x16f   :  { %1165 = vmatprep.subr.bf16.mxu1 %v3281_v31  ;;  %v3325_v31 = vld [vmem:[%s4660_s7 + $0x20] ss:$8 sps:$4 sm:$0xff]  }
 0x172   :  { %1166 = vmatpush1.bf16.msra.mxu1 %v3279_v32  ;;  %v3330_v32 = vld [vmem:[%s4660_s7 + $0x34] ss:$8 sps:$4 sm:$0xff]  }
 0x173   :  { %1167 = vmatprep.subr.bf16.mxu1 %v3287_v33  ;;  %v3328_v33 = vld [vmem:[%s4660_s7 + $0x30] ss:$8 sps:$4 sm:$0xff]  }
 0x176   :  { %1168 = vmatpush1.bf16.msra.mxu1 %v3285_v34  ;;  %v3333_v34 = vld [vmem:[%s4660_s7 + $0x44] ss:$8 sps:$4 sm:$0xff]  }
 0x177   :  { %1169 = vmatprep.subr.bf16.mxu1 %v3293_v35  ;;  %v3331_v35 = vld [vmem:[%s4660_s7 + $0x40] ss:$8 sps:$4 sm:$0xff]  }
 0x17a   :  { %1170 = vmatpush1.bf16.msra.mxu1 %v3291_v36  ;;  %v3336_v36 = vld [vmem:[%s4660_s7 + $0x54] ss:$8 sps:$4 sm:$0xff]  }
 0x17b   :  { %1171 = vmatprep.subr.bf16.mxu1 %v3299_v40  ;;  %v3342_v40 = vld [vmem:[%s4660_s7 + $0x74] ss:$8 sps:$4 sm:$0xff]  }
 0x17e   :  { %1172 = vmatpush1.bf16.msra.mxu1 %v3297_v41  ;;  %v3340_v41 = vld [vmem:[%s4660_s7 + $0x70] ss:$8 sps:$4 sm:$0xff]  }
 0x214   :  { %v757_v51 = vpop.f32.mrb[0].mxu1  ;;  %v798_v52 = vpop.f32.mrb[4].mxu0 }
 0x215   :  { %v758_v53 = vadd.f32 %v757_v51, %v545_v45  ;;  %v799_v54 = vadd.f32 %v798_v52, %v553_v48  ;;  %v759_v55 = vpop.f32.mrb[1].mxu1  ;;  %v800_v56 = vpop.f32.mrb[5].mxu0  ;;  %v3348_v45 = vld [vmem:[%s4660_s7 + $0x94] ss:$8 sps:$4 sm:$0xff]   ;;  %v3346_v48 = vld [vmem:[%s4660_s7 + $0x90] ss:$8 sps:$4 sm:$0xff]  }
 0x216   :  { %v760_v57 = vadd.f32 %v759_v55, %v549_v50  ;;  %v761_v58 = vpop.f32.mrb[2].mxu1  ;;  %v801_v46 = vpop.f32.mrb[6].mxu0  ;;  %v3351_v50 = vld [vmem:[%s4660_s7 + $0xa4] ss:$8 sps:$4 sm:$0xff]   ;;  %v3349_v51 = vld [vmem:[%s4660_s7 + $0xa0] ss:$8 sps:$4 sm:$0xff]  }
 0x217   :  { %v804_v59 = vmax.f32 %v758_v53, 0.0  ;;  %v806_v60 = vmax.f32 %v799_v54, 0.0  ;;  %v762_v61 = vpop.f32.mrb[3].mxu1  ;;  %v802_v62 = vpop.f32.mrb[7].mxu0  ;;  %v3354_v52 = vld [vmem:[%s4660_s7 + $0xb4] ss:$8 sps:$4 sm:$0xff]  }
 0x218   :  { %v805_v63 = vmax.f32 %v760_v57, 0.0  ;;  %v3352_v53 = vld [vmem:[%s4660_s7 + $0xb0] ss:$8 sps:$4 sm:$0xff]   ;;  %v3357_v54 = vld [vmem:[%s4660_s7 + $0xc4] ss:$8 sps:$4 sm:$0xff]  }
 0x219   :  { %v809_v4 = vpack.c.bf16 %v806_v60, %v806_v60  ;;  %v807_v7 = vpack.c.bf16 %v804_v59, %v804_v59  ;;  %v3355_v55 = vld [vmem:[%s4660_s7 + $0xc0] ss:$8 sps:$4 sm:$0xff]   ;;  %v3360_v56 = vld [vmem:[%s4660_s7 + $0xd4] ss:$8 sps:$4 sm:$0xff]   ;;  %v3358_v57 = vld [vmem:[%s4660_s7 + $0xd0] ss:$8 sps:$4 sm:$0xff]  }
 0x21a   :  { %v808_v5 = vpack.c.bf16 %v805_v63, %v805_v63  ;;  %v3363_v58 = vld [vmem:[%s4660_s7 + $0xe4] ss:$8 sps:$4 sm:$0xff]   ;;  %v3361_v46 = vld [vmem:[%s4660_s7 + $0xe0] ss:$8 sps:$4 sm:$0xff]   ;;  %v3366_v59 = vld [vmem:[%s4660_s7 + $0xf4] ss:$8 sps:$4 sm:$0xff]  }
 0x21b   :  { %2901 = vmatmul.mubr.msk.bf16.vlgmr.msra.gmra.mrb[8].mxu0 %vm1127_vm5, %v809_v4  ;;  %v3364_v60 = vld [vmem:[%s4660_s7 + $0xf0] ss:$8 sps:$4 sm:$0xff]   ;;  %v3369_v61 = vld [vmem:[%s4660_s7 + $0x104] ss:$8 sps:$4 sm:$0xff]  }
 0x21c   :  { %3091 = vmatpush3.bf16.msra.mxu0 %v3301_v3  ;;  %1173 = vmatprep.mubr.bf16.mxu1 %v808_v5  ;;  %v3376_v62 = vld [vmem:[#allocation7] ss:$12 sps:$4 sm:$0xff]   ;;  %v3378_v63 = vld [vmem:[#allocation7 + $0x4] ss:$12 sps:$4 sm:$0xff]   ;;  %v3381_v3 = vld [vmem:[#allocation7 + $0x1c] ss:$12 sps:$4 sm:$0xff]  }
 0x21d   :  { %1255 = vmatprep.mubr.bf16.mxu0 %v808_v5  ;;  %1174 = vmatmul.mubr.bf16.vlgmr.msra.gmra.mrb[4].mxu1 %v807_v7  ;;  %v3384_v5 = vld [vmem:[#allocation7 + $0x34] ss:$12 sps:$4 sm:$0xff]  }
 0x21e   :  { %3092 = vmatprep.subr.bf16.mxu0 %v3302_v6  ;;  %1785 = vmatprep.subr.bf16.mxu1 %v3378_v63  ;;  %v3382_v6 = vld [vmem:[#allocation7 + $0x30] ss:$12 sps:$4 sm:$0xff]  }
 0x21f   :  { %1786 = vmatpush1.bf16.msra.mxu1 %v3376_v62  ;;  %v296_v62 = vld [vmem:[#allocation7 + $0xd8] sm:$0x77] }
 0x220   :  { %3093 = vmatpush3.bf16.msra.mxu0 %v3303_v8  ;;  %1787 = vmatprep.subr.bf16.mxu1 %v3381_v3  ;;  %v3385_v8 = vld [vmem:[#allocation7 + $0x48] ss:$12 sps:$4 sm:$0xff]   ;;  %v2971_v63 = vcombine.high %v296_v62, %v296_v62  ;;  %v2970_v3 = vcombine.low %v296_v62, %v296_v62 }
 0x221   :  { %3094 = vmatprep.subr.bf16.mxu0 %v3304_v9  ;;  %v3390_v9 = vld [vmem:[#allocation7 + $0x64] ss:$12 sps:$4 sm:$0xff]  }
 0x222   :  { %v3443_v62 = vld [vmem:[%s4664_s11 + $0x8] ss:$12 sps:$4 sm:$0xff]  }
 0x224   :  { %3095 = vmatpush3.bf16.msra.mxu0 %v3305_v10  ;;  %v3388_v10 = vld [vmem:[#allocation7 + $0x60] ss:$12 sps:$4 sm:$0xff]  }
 0x225   :  { %3096 = vmatprep.subr.bf16.mxu0 %v3306_v11  ;;  %v3393_v11 = vld [vmem:[#allocation7 + $0x7c] ss:$12 sps:$4 sm:$0xff]  }
 0x228   :  { %3097 = vmatpush3.bf16.msra.mxu0 %v3307_v12  ;;  %v3391_v12 = vld [vmem:[#allocation7 + $0x78] ss:$12 sps:$4 sm:$0xff]  }
 0x229   :  { %3098 = vmatprep.subr.bf16.mxu0 %v3308_v13  ;;  %v3396_v13 = vld [vmem:[#allocation7 + $0x94] ss:$12 sps:$4 sm:$0xff]  }
 0x22c   :  { %3099 = vmatpush3.bf16.msra.mxu0 %v3309_v14  ;;  %v3394_v14 = vld [vmem:[#allocation7 + $0x90] ss:$12 sps:$4 sm:$0xff]  }
 0x22d   :  { %3100 = vmatprep.subr.bf16.mxu0 %v3310_v15  ;;  %v3399_v15 = vld [vmem:[#allocation7 + $0xac] ss:$12 sps:$4 sm:$0xff]  }
 0x230   :  { %3101 = vmatpush3.bf16.msra.mxu0 %v3311_v16  ;;  %v3397_v16 = vld [vmem:[#allocation7 + $0xa8] ss:$12 sps:$4 sm:$0xff]  }
 0x231   :  { %3102 = vmatprep.subr.bf16.mxu0 %v3312_v17  ;;  %v220_v17 = vld [vmem:[%s4659_s6] sm:$0x7] }
 0x234   :  { %3103 = vmatpush3.bf16.msra.mxu0 %v3313_v18  ;;  %v814_v18 = vrot.slane %v220_v17, %v3921_v47 }
 0x235   :  { %3104 = vmatprep.subr.bf16.mxu0 %v3314_v19 }
 0x238   :  { %3105 = vmatpush3.bf16.msra.mxu0 %v3315_v20  ;;  %v818_v20 = vrot.slane %v220_v17, %v3924_v49 }
 0x239   :  { %3142 = vmatprep.subr.bf16.mxu0 %v3672_v22 }
 0x23b   :  { %1256 = vmatmul.mubr.bf16.vlgmr.msra.gmra.mrb[12].mxu0 %v807_v7  ;;  %v3387_v7 = vld [vmem:[#allocation7 + $0x4c] ss:$12 sps:$4 sm:$0xff]  }
 0x23c   :  { %3143 = vmatpush3.bf16.msra.mxu0 %v3316_v21  ;;  %3148 = vmatprep.mubr.msk.bf16.mxu0 %vm3673_vm6, %v3672_v22 }
 0x23d   :  { %3144 = vmatprep.subr.bf16.mxu0 %v3672_v22 }
 0x240   :  { %3145 = vmatpush3.bf16.msra.mxu0 %v3317_v23 }
 0x241   :  { %3146 = vmatprep.subr.bf16.mxu0 %v3672_v22 }
 0x244   :  { %3147 = vmatpush3.bf16.msra.mxu0 %v1139_v25 }
 0x245   :  { %1517 = vmatprep.subr.bf16.mxu0 %v3321_v26 }
 0x247   :  { %3149 = vmatmul.mubr.msk.bf16.vlgmr.msra.gmra.mrb[16].mxu0 %vm1127_vm5, %v809_v4  ;;  %v3379_v4 = vld [vmem:[#allocation7 + $0x18] ss:$12 sps:$4 sm:$0xff]  }
 0x248   :  { %1518 = vmatpush1.bf16.msra.mxu0 %v3319_v27  ;;  %1788 = vmatpush1.bf16.msra.mxu1 %v3379_v4  ;;  %v1777_v4 = vsel %vm713_vm2, %v2970_v3, 0  ;;  %v3448_v3 = vld [vmem:[%s4664_s11 + $0x20] ss:$12 sps:$4 sm:$0xff]  }
 0x249   :  { %1519 = vmatprep.subr.bf16.mxu0 %v3324_v28  ;;  %1789 = vmatprep.subr.bf16.mxu1 %v3384_v5  ;;  %v3415_v5 = vld [vmem:[%s4664_s11] ss:$12 sps:$4 sm:$0xff]  }
 0x24c   :  { %1520 = vmatpush1.bf16.msra.mxu0 %v3322_v29  ;;  %1790 = vmatpush1.bf16.msra.mxu1 %v3382_v6  ;;  %v3417_v6 = vld [vmem:[%s4664_s11 + $0x4] ss:$12 sps:$4 sm:$0xff]  }
 0x24d   :  { %1521 = vmatprep.subr.bf16.mxu0 %v3327_v30  ;;  %1791 = vmatprep.subr.bf16.mxu1 %v3387_v7  ;;  %v3420_v7 = vld [vmem:[%s4664_s11 + $0x1c] ss:$12 sps:$4 sm:$0xff]  }
 0x250   :  { %1522 = vmatpush1.bf16.msra.mxu0 %v3325_v31  ;;  %1792 = vmatpush1.bf16.msra.mxu1 %v3385_v8  ;;  %v3418_v8 = vld [vmem:[%s4664_s11 + $0x18] ss:$12 sps:$4 sm:$0xff]  }
 0x251   :  { %1523 = vmatprep.subr.bf16.mxu0 %v3330_v32  ;;  %1793 = vmatprep.subr.bf16.mxu1 %v3390_v9  ;;  %v3423_v9 = vld [vmem:[%s4664_s11 + $0x34] ss:$12 sps:$4 sm:$0xff]  }
 0x254   :  { %1524 = vmatpush1.bf16.msra.mxu0 %v3328_v33  ;;  %1794 = vmatpush1.bf16.msra.mxu1 %v3388_v10  ;;  %v3421_v10 = vld [vmem:[%s4664_s11 + $0x30] ss:$12 sps:$4 sm:$0xff]  }
 0x255   :  { %1525 = vmatprep.subr.bf16.mxu0 %v3333_v34  ;;  %1795 = vmatprep.subr.bf16.mxu1 %v3393_v11  ;;  %v3426_v11 = vld [vmem:[%s4664_s11 + $0x4c] ss:$12 sps:$4 sm:$0xff]  }
 0x258   :  { %1526 = vmatpush1.bf16.msra.mxu0 %v3331_v35  ;;  %1796 = vmatpush1.bf16.msra.mxu1 %v3391_v12  ;;  %v3424_v12 = vld [vmem:[%s4664_s11 + $0x48] ss:$12 sps:$4 sm:$0xff]  }
 0x259   :  { %1527 = vmatprep.subr.bf16.mxu0 %v3336_v36  ;;  %1797 = vmatprep.subr.bf16.mxu1 %v3396_v13  ;;  %v3367_v36 = vld [vmem:[%s4660_s7 + $0x100] ss:$8 sps:$4 sm:$0xff]   ;;  %v3429_v13 = vld [vmem:[%s4664_s11 + $0x64] ss:$12 sps:$4 sm:$0xff]  }
 0x25c   :  { %1528 = vmatpush1.bf16.msra.mxu0 %v3334_v37  ;;  %1798 = vmatpush1.bf16.msra.mxu1 %v3394_v14  ;;  %v3427_v14 = vld [vmem:[%s4664_s11 + $0x60] ss:$12 sps:$4 sm:$0xff]  }
 0x25d   :  { %1529 = vmatprep.subr.bf16.mxu0 %v3339_v38  ;;  %1799 = vmatprep.subr.bf16.mxu1 %v3399_v15  ;;  %v3372_v38 = vld [vmem:[%s4660_s7 + $0x114] ss:$8 sps:$4 sm:$0xff]  }
 0x25e   :  { %v3432_v15 = vld [vmem:[%s4664_s11 + $0x7c] ss:$12 sps:$4 sm:$0xff]  }
 0x260   :  { %1530 = vmatpush1.bf16.msra.mxu0 %v3337_v39  ;;  %1800 = vmatpush1.bf16.msra.mxu1 %v3397_v16  ;;  %v3370_v39 = vld [vmem:[%s4660_s7 + $0x110] ss:$8 sps:$4 sm:$0xff]  }
 0x261   :  { %1531 = vmatprep.subr.bf16.mxu0 %v3342_v40  ;;  %v3373_v40 = vld [vmem:[%s4660_s7 + $0x124] ss:$8 sps:$4 sm:$0x3f]  }
 0x262   :  { %v3430_v16 = vld [vmem:[%s4664_s11 + $0x78] ss:$12 sps:$4 sm:$0xff]  }
 0x264   :  { %1532 = vmatpush1.bf16.msra.mxu0 %v3340_v41  ;;  %v3375_v41 = vld [vmem:[%s4660_s7 + $0x120] ss:$8 sps:$4 sm:$0x3f]  }
 0x265   :  { %1533 = vmatprep.subr.bf16.mxu0 %v3345_v42  ;;  %v1512_v42 = vsel %vm1131_vm4, %v3375_v41, 0 }
 0x268   :  { %1534 = vmatpush1.bf16.msra.mxu0 %v3343_v44 }
 0x269   :  { %1535 = vmatprep.subr.bf16.mxu0 %v3348_v45 }
 0x26c   :  { %1536 = vmatpush1.bf16.msra.mxu0 %v3346_v48 }
 0x26d   :  { %1537 = vmatprep.subr.bf16.mxu0 %v3351_v50 }
 0x270   :  { %1538 = vmatpush1.bf16.msra.mxu0 %v3349_v51 }
 0x271   :  { %1539 = vmatprep.subr.bf16.mxu0 %v3354_v52  ;;  %v822_v52 = vrot.slane %v220_v17, %v4053_v43  ;;  %v3435_v17 = vld [vmem:[%s4664_s11 + $0x94] ss:$12 sps:$4 sm:$0xff]  }
 0x274   :  { %1540 = vmatpush1.bf16.msra.mxu0 %v3352_v53 }
 0x275   :  { %1541 = vmatprep.subr.bf16.mxu0 %v3357_v54 }
 0x278   :  { %1542 = vmatpush1.bf16.msra.mxu0 %v3355_v55 }
 0x279   :  { %1543 = vmatprep.subr.bf16.mxu0 %v3360_v56 }
 0x27c   :  { %1544 = vmatpush1.bf16.msra.mxu0 %v3358_v57 }
 0x27d   :  { %1545 = vmatprep.subr.bf16.mxu0 %v3363_v58 }
 0x280   :  { %1546 = vmatpush1.bf16.msra.mxu0 %v3361_v46 }
 0x281   :  { %1547 = vmatprep.subr.bf16.mxu0 %v3366_v59 }
 0x284   :  { %1548 = vmatpush1.bf16.msra.mxu0 %v3364_v60  ;;  %v3402_v60 = vld [vmem:[#allocation7 + $0xc4] ss:$12 sps:$4 sm:$0xff]  }
 0x285   :  { %1558 = vmatprep.subr.bf16.mxu0 %v3369_v61  ;;  %v3400_v61 = vld [vmem:[#allocation7 + $0xc0] ss:$12 sps:$4 sm:$0xff]   ;;  %1801 = vmatprep.subr.bf16.mxu1 %v3402_v60 }
 0x286   :  { %1802 = vmatpush1.bf16.msra.mxu1 %v3400_v61  ;;  %v3442_v61 = vld [vmem:[%s4664_s11 + $0xc8] ss:$12 sps:$4 sm:$0xff]  }
 0x287   :  { %2973 = vmatprep.subr.msk.bf16.mxu1 %vm713_vm2, %v2971_v63  ;;  %v3447_v63 = vld [vmem:[%s4664_s11 + $0xe0] ss:$12 sps:$4 sm:$0xff]  }
 0x28a   :  { %1804 = vmatpush1.bf16.msra.mxu1 %v1777_v4  ;;  %v3452_v4 = vld [vmem:[%s4664_s11 + $0xf8] ss:$12 sps:$4 sm:$0xff]  }
 0x28b   :  { %1826 = vmatprep.subr.bf16.mxu1 %v3671_v0 }
 0x2ee   :  { %v1216_v19 = vpop.f32.mrb[8].mxu0 }
 0x2ef   :  { %v1218_v21 = vpop.f32.mrb[9].mxu0 }
 0x2f0   :  { %v1175_v23 = vpop.f32.mrb[4].mxu1  ;;  %v1220_v24 = vpop.f32.mrb[10].mxu0 }
 0x2f1   :  { %v1176_v25 = vadd.f32 %v1175_v23, %v814_v18  ;;  %v1177_v26 = vpop.f32.mrb[5].mxu1  ;;  %v1221_v27 = vpop.f32.mrb[11].mxu0  ;;  %v3433_v18 = vld [vmem:[%s4664_s11 + $0x90] ss:$12 sps:$4 sm:$0xff]   ;;  %v3439_v23 = vld [vmem:[%s4664_s11 + $0xc0] ss:$12 sps:$4 sm:$0xff]  }
 0x2f2   :  { %v1178_v28 = vadd.f32 %v1177_v26, %v818_v20  ;;  %v1179_v29 = vpop.f32.mrb[6].mxu1  ;;  %v3436_v20 = vld [vmem:[%s4664_s11 + $0xa8] ss:$12 sps:$4 sm:$0xff]   ;;  %v3449_v27 = vld [vmem:[%s4664_s11 + $0xf0] ss:$12 sps:$4 sm:$0xff]  }
 0x2f3   :  { %v1217_v30 = vadd.f32 %v1216_v19, %v1176_v25  ;;  %v1180_v31 = vpop.f32.mrb[7].mxu1  ;;  %v3438_v19 = vld [vmem:[%s4664_s11 + $0xac] ss:$12 sps:$4 sm:$0xff]   ;;  %v3446_v24 = vld [vmem:[%s4664_s11 + $0xdc] ss:$12 sps:$4 sm:$0xff]  }
 0x2f4   :  { %v1219_v32 = vadd.f32 %v1218_v21, %v1178_v28  ;;  %v3441_v21 = vld [vmem:[%s4664_s11 + $0xc4] ss:$12 sps:$4 sm:$0xff]   ;;  %v3451_v26 = vld [vmem:[%s4664_s11 + $0xf4] ss:$12 sps:$4 sm:$0xff]   ;;  %v3456_v28 = vld [vmem:[%s4664_s11 + $0x10c] ss:$12 sps:$4 sm:$0xff]  }
 0x2f5   :  { %v1303_v33 = vmax.f32 %v1217_v30, 0.0  ;;  %v3444_v25 = vld [vmem:[%s4664_s11 + $0xd8] ss:$12 sps:$4 sm:$0xff]   ;;  %v3454_v29 = vld [vmem:[%s4664_s11 + $0x108] ss:$12 sps:$4 sm:$0xff]  }
 0x2f6   :  { %v1304_v34 = vmax.f32 %v1219_v32, 0.0  ;;  %v3461_v30 = vld [vmem:[%s4664_s11 + $0x124] ss:$12 sps:$4 sm:$0xff]   ;;  %v3459_v31 = vld [vmem:[%s4664_s11 + $0x120] ss:$12 sps:$4 sm:$0xff]  }
 0x2f7   :  { %v1306_v37 = vpack.c.bf16 %v1303_v33, %v1303_v33  ;;  %v3466_v32 = vld [vmem:[%s4664_s11 + $0x13c] ss:$12 sps:$4 sm:$0xff]   ;;  %v3464_v33 = vld [vmem:[%s4664_s11 + $0x138] ss:$12 sps:$4 sm:$0xff]  }
 0x2f8   :  { %v1307_v35 = vpack.c.bf16 %v1304_v34, %v1304_v34  ;;  %v259_v34 = vld [vmem:[%s4661_s8] sm:$0x3] }
 0x2fa   :  { %1549 = vmatprep.mubr.bf16.mxu0 %v1307_v35  ;;  %v1313_v35 = vrot.slane %v259_v34, %v3921_v47 }
 0x2fb   :  { %1550 = vmatmul.mubr.bf16.vlgmr.msra.gmra.mrb[20].mxu0 %v1306_v37 }
 0x2fc   :  { %1559 = vmatpush1.bf16.msra.mxu0 %v3367_v36  ;;  %1590 = vmatprep.mubr.bf16.mxu0 %v3671_v0  ;;  %v1317_v36 = vrot.slane %v259_v34, %v3924_v49  ;;  %v3479_v34 = vld [vmem:[%s4664_s11 + $0x180] ss:$12 sps:$4 sm:$0xff]  }
 0x2fd   :  { %1560 = vmatprep.subr.bf16.mxu0 %v3372_v38 }
 0x300   :  { %1561 = vmatpush1.bf16.msra.mxu0 %v3370_v39 }
 0x301   :  { %2941 = vmatprep.subr.msk.bf16.mxu0 %vm1131_vm4, %v3373_v40 }
 0x304   :  { %1563 = vmatpush1.bf16.msra.mxu0 %v1512_v42 }
 0x305   :  { %2201 = vmatprep.subr.bf16.mxu0 %v3417_v6  ;;  %v3457_v6 = vld [vmem:[%s4664_s11 + $0x110] ss:$12 sps:$4 sm:$0xff]  }
 0x30e   :  { %v3106_v44 = vpop.f32.mrb[12].mxu0 }
 0x30f   :  { %v3107_v45 = vpop.f32.mrb[13].mxu0 }
 0x310   :  { %v3108_v48 = vadd.f32 %v3107_v45, %v3106_v44  ;;  %v3109_v50 = vpop.f32.mrb[14].mxu0 }
 0x311   :  { %v3110_v51 = vpop.f32.mrb[15].mxu0 }
 0x312   :  { %v1258_v53 = vadd.f32 %v3108_v48, %v822_v52  ;;  %v3405_v52 = vld [vmem:[#allocation7 + $0x8] ss:$12 sps:$4 sm:$0xff]  }
 0x31a   :  { %v1297_v54 = vpop.f32.mrb[16].mxu0 }
 0x31b   :  { %v1298_v55 = vadd.f32 %v1297_v54, %v1258_v53  ;;  %v3150_v56 = vpop.f32.mrb[17].mxu0  ;;  %v3406_v54 = vld [vmem:[#allocation7 + $0x20] ss:$12 sps:$4 sm:$0xff]  }
 0x31c   :  { %v1300_v57 = vpop.f32.mrb[18].mxu0  ;;  %v3410_v56 = vld [vmem:[#allocation7 + $0x80] ss:$12 sps:$4 sm:$0xff]  }
 0x31d   :  { %v1305_v58 = vmax.f32 %v1298_v55, 0.0  ;;  %v3151_v46 = vpop.f32.mrb[19].mxu0  ;;  %v3409_v55 = vld [vmem:[#allocation7 + $0x68] ss:$12 sps:$4 sm:$0xff]   ;;  %v3411_v57 = vld [vmem:[#allocation7 + $0x98] ss:$12 sps:$4 sm:$0xff]  }
 0x31e   :  { %v3413_v46 = vld [vmem:[#allocation7 + $0xc8] ss:$12 sps:$4 sm:$0xff]  }
 0x31f   :  { %v1308_v59 = vpack.c.bf16 %v1305_v58, %v1305_v58  ;;  %v3412_v58 = vld [vmem:[#allocation7 + $0xb0] ss:$12 sps:$4 sm:$0xff]  }
 0x321   :  { %2942 = vmatmul.mubr.msk.bf16.vlgmr.msra.gmra.mrb[20].mxu0 %vm1127_vm5, %v1308_v59  ;;  %v3414_v59 = vld [vmem:[#allocation7 + $0xe0] ss:$0 sps:$4 sm:$0x77]  }
 0x322   :  { %2202 = vmatpush1.bf16.msra.mxu0 %v3415_v5  ;;  %v1783_v60 = vsel %vm713_vm2, %v3414_v59, 0  ;;  %v3453_v5 = vld [vmem:[%s4664_s11 + $0x38] ss:$12 sps:$4 sm:$0xff]  }
 0x323   :  { %2203 = vmatprep.subr.bf16.mxu0 %v3420_v7  ;;  %v3458_v7 = vld [vmem:[%s4664_s11 + $0x50] ss:$12 sps:$4 sm:$0xff]   ;;  %v3499_v59 = vld [vmem:[%s4666_s13 + $0x24] ss:$8 sps:$4 sm:$0xff]  }
 0x326   :  { %2204 = vmatpush1.bf16.msra.mxu0 %v3418_v8  ;;  %v3462_v8 = vld [vmem:[%s4664_s11 + $0x128] ss:$12 sps:$4 sm:$0xff]  }
 0x327   :  { %2205 = vmatprep.subr.bf16.mxu0 %v3423_v9  ;;  %v3463_v9 = vld [vmem:[%s4664_s11 + $0x68] ss:$12 sps:$4 sm:$0xff]  }
 0x32a   :  { %2206 = vmatpush1.bf16.msra.mxu0 %v3421_v10  ;;  %v3467_v10 = vld [vmem:[%s4664_s11 + $0x140] ss:$12 sps:$4 sm:$0xff]  }
 0x32b   :  { %2207 = vmatprep.subr.bf16.mxu0 %v3426_v11  ;;  %v3468_v11 = vld [vmem:[%s4664_s11 + $0x80] ss:$12 sps:$4 sm:$0xff]  }
 0x32e   :  { %2208 = vmatpush1.bf16.msra.mxu0 %v3424_v12  ;;  %v3471_v12 = vld [vmem:[%s4664_s11 + $0x154] ss:$12 sps:$4 sm:$0xff]  }
 0x32f   :  { %2209 = vmatprep.subr.bf16.mxu0 %v3429_v13  ;;  %v3472_v13 = vld [vmem:[%s4664_s11 + $0x158] ss:$12 sps:$4 sm:$0xff]  }
 0x332   :  { %2210 = vmatpush1.bf16.msra.mxu0 %v3427_v14  ;;  %v3469_v14 = vld [vmem:[%s4664_s11 + $0x150] ss:$12 sps:$4 sm:$0xff]  }
 0x333   :  { %2211 = vmatprep.subr.bf16.mxu0 %v3432_v15  ;;  %v3473_v15 = vld [vmem:[%s4664_s11 + $0x98] ss:$12 sps:$4 sm:$0xff]  }
 0x336   :  { %2212 = vmatpush1.bf16.msra.mxu0 %v3430_v16  ;;  %v3476_v16 = vld [vmem:[%s4664_s11 + $0x16c] ss:$12 sps:$4 sm:$0xff]  }
 0x337   :  { %2213 = vmatprep.subr.bf16.mxu0 %v3435_v17  ;;  %v3477_v17 = vld [vmem:[%s4664_s11 + $0x170] ss:$12 sps:$4 sm:$0xff]  }
 0x33a   :  { %2214 = vmatpush1.bf16.msra.mxu0 %v3433_v18  ;;  %v3474_v18 = vld [vmem:[%s4664_s11 + $0x168] ss:$12 sps:$4 sm:$0xff]  }
 0x33b   :  { %2215 = vmatprep.subr.bf16.mxu0 %v3438_v19  ;;  %v3478_v19 = vld [vmem:[%s4664_s11 + $0xb0] ss:$12 sps:$4 sm:$0xff]  }
 0x33e   :  { %2216 = vmatpush1.bf16.msra.mxu0 %v3436_v20  ;;  %v3481_v20 = vld [vmem:[%s4664_s11 + $0x184] ss:$12 sps:$4 sm:$0xff]  }
 0x33f   :  { %2217 = vmatprep.subr.bf16.mxu0 %v3441_v21  ;;  %v298_v21 = vld [vmem:[%s4663_s10] sm:$0x7] }
 0x342   :  { %2218 = vmatpush1.bf16.msra.mxu0 %v3439_v23  ;;  %v1609_v23 = vrot.slane %v298_v21, %v3921_v47 }
 0x343   :  { %2219 = vmatprep.subr.bf16.mxu0 %v3446_v24  ;;  %v1613_v24 = vrot.slane %v298_v21, %v3924_v49 }
 0x346   :  { %2220 = vmatpush1.bf16.msra.mxu0 %v3444_v25 }
 0x347   :  { %2221 = vmatprep.subr.bf16.mxu0 %v3451_v26 }
 0x34a   :  { %2222 = vmatpush1.bf16.msra.mxu0 %v3449_v27 }
 0x34b   :  { %2223 = vmatprep.subr.bf16.mxu0 %v3456_v28 }
 0x34e   :  { %2224 = vmatpush1.bf16.msra.mxu0 %v3454_v29 }
 0x34f   :  { %2225 = vmatprep.subr.bf16.mxu0 %v3461_v30 }
 0x352   :  { %2226 = vmatpush1.bf16.msra.mxu0 %v3459_v31 }
 0x353   :  { %2227 = vmatprep.subr.bf16.mxu0 %v3466_v32 }
 0x356   :  { %2228 = vmatpush1.bf16.msra.mxu0 %v3464_v33 }
 0x357   :  { %2229 = vmatprep.subr.bf16.mxu0 %v3471_v12  ;;  %v3520_v12 = vld [vmem:[%s4666_s13 + $0x94] ss:$8 sps:$4 sm:$0xff]  }
 0x35a   :  { %2230 = vmatpush1.bf16.msra.mxu0 %v3469_v14  ;;  %v3523_v14 = vld [vmem:[%s4666_s13 + $0xa4] ss:$8 sps:$4 sm:$0xff]  }
 0x35b   :  { %2231 = vmatprep.subr.bf16.mxu0 %v3476_v16  ;;  %v3526_v16 = vld [vmem:[%s4666_s13 + $0xb4] ss:$8 sps:$4 sm:$0xff]  }
 0x35e   :  { %2232 = vmatpush1.bf16.msra.mxu0 %v3474_v18  ;;  %v3529_v18 = vld [vmem:[%s4666_s13 + $0xc4] ss:$8 sps:$4 sm:$0xff]  }
 0x35f   :  { %2242 = vmatprep.subr.bf16.mxu0 %v3481_v20  ;;  %v3532_v20 = vld [vmem:[%s4666_s13 + $0xd4] ss:$8 sps:$4 sm:$0xff]  }
 0x3f4   :  { %v1592_v37 = vpop.f32.mrb[20].mxu0 }
 0x3f5   :  { %v3166_v38 = vadd.f32 %v1592_v37, %v1313_v35  ;;  %v1594_v39 = vpop.f32.mrb[21].mxu0  ;;  %v3482_v35 = vld [vmem:[%s4664_s11 + $0x188] ss:$12 sps:$4 sm:$0xff]  }
 0x3f6   :  { %v3167_v40 = vadd.f32 %v1594_v39, %v1317_v36  ;;  %v1596_v41 = vpop.f32.mrb[22].mxu0  ;;  %v3485_v37 = vld [vmem:[%s4664_s11 + $0x19c] ss:$12 sps:$4 sm:$0xff]   ;;  %v3486_v39 = vld [vmem:[%s4664_s11 + $0x1a0] ss:$12 sps:$4 sm:$0xff]  }
 0x3f7   :  { %v1599_v42 = vmax.f32 %v3166_v38, 0.0  ;;  %v1597_v44 = vpop.f32.mrb[23].mxu0  ;;  %v3483_v38 = vld [vmem:[%s4664_s11 + $0x198] ss:$12 sps:$4 sm:$0xff]  }
 0x3f8   :  { %v1600_v45 = vmax.f32 %v3167_v40, 0.0  ;;  %v3487_v40 = vld [vmem:[%s4664_s11 + $0x1b4] ss:$12 sps:$4 sm:$0x3f]  }
 0x3f9   :  { %v4340_v48 = vadd.f32 %v3928_v1, %v1599_v42  ;;  %v3407_v1 = vld [vmem:[#allocation7 + $0x38] ss:$12 sps:$4 sm:$0xff]   ;;  %v3489_v41 = vld [vmem:[%s4664_s11 + $0x1b0] ss:$12 sps:$4 sm:$0x3f]  }
 0x3fa   :  { %v4343_v50 = vadd.f32 %v3930_v2, %v1600_v45  ;;  %v3408_v2 = vld [vmem:[#allocation7 + $0x50] ss:$12 sps:$4 sm:$0xff]   ;;  %v2193_v44 = vsel %vm1131_vm4, %v3489_v41, 0 }
 0x3fb   :  { %v1603_v53 = vpack.c.bf16 %v4340_v48, %v4340_v48  ;;  %v3490_v42 = vld [vmem:[%s4664_s11 + $0x1b8] ss:$12 sps:$4 sm:$0x3f]  }
 0x3fc   :  { %v1604_v51 = vpack.c.bf16 %v4343_v50, %v4343_v50  ;;  %v2199_v45 = vsel %vm1131_vm4, %v3490_v42, 0 }
 0x3fe   :  { %2974 = vmatprep.mubr.msk.bf16.mxu1 %vm709_vm3, %v1604_v51 }
 0x3ff   :  { %1818 = vmatmul.mubr.bf16.vlgmr.msra.gmra.mrb[8].mxu1 %v1603_v53 }
 0x400   :  { %1827 = vmatpush1.bf16.msra.mxu1 %v3405_v52  ;;  %2975 = vmatprep.mubr.msk.bf16.mxu1 %vm709_vm3, %v1604_v51  ;;  %v3493_v51 = vld [vmem:[%s4666_s13 + $0x4] ss:$8 sps:$4 sm:$0xff]   ;;  %v1617_v52 = vrot.slane %v298_v21, %v4053_v43  ;;  %v3530_v21 = vld [vmem:[%s4666_s13 + $0xd0] ss:$8 sps:$4 sm:$0xff]  }
 0x401   :  { %1828 = vmatprep.subr.bf16.mxu1 %v3671_v0 }
 0x404   :  { %1829 = vmatpush1.bf16.msra.mxu1 %v3406_v54 }
 0x405   :  { %1830 = vmatprep.subr.bf16.mxu1 %v3671_v0 }
 0x408   :  { %1831 = vmatpush1.bf16.msra.mxu1 %v3407_v1 }
 0x409   :  { %1832 = vmatprep.subr.bf16.mxu1 %v3671_v0 }
 0x40c   :  { %1833 = vmatpush1.bf16.msra.mxu1 %v3408_v2 }
 0x40d   :  { %1834 = vmatprep.subr.bf16.mxu1 %v3671_v0 }
 0x410   :  { %1835 = vmatpush1.bf16.msra.mxu1 %v3409_v55 }
 0x411   :  { %1836 = vmatprep.subr.bf16.mxu1 %v3671_v0 }
 0x414   :  { %1837 = vmatpush1.bf16.msra.mxu1 %v3410_v56 }
 0x415   :  { %1838 = vmatprep.subr.bf16.mxu1 %v3671_v0 }
 0x418   :  { %1839 = vmatpush1.bf16.msra.mxu1 %v3411_v57 }
 0x419   :  { %1840 = vmatprep.subr.bf16.mxu1 %v3671_v0 }
 0x41c   :  { %1841 = vmatpush1.bf16.msra.mxu1 %v3412_v58  ;;  %v3496_v58 = vld [vmem:[%s4666_s13 + $0x14] ss:$8 sps:$4 sm:$0xff]  }
 0x41d   :  { %1842 = vmatprep.subr.bf16.mxu1 %v3671_v0 }
 0x420   :  { %1843 = vmatpush1.bf16.msra.mxu1 %v3413_v46  ;;  %v3494_v46 = vld [vmem:[%s4666_s13 + $0x10] ss:$8 sps:$4 sm:$0xff]  }
 0x421   :  { %1844 = vmatprep.subr.bf16.mxu1 %v3671_v0 }
 0x424   :  { %1845 = vmatpush1.bf16.msra.mxu1 %v1783_v60  ;;  %v3497_v60 = vld [vmem:[%s4666_s13 + $0x20] ss:$8 sps:$4 sm:$0xff]  }
 0x425   :  { %3116 = vmatprep.subr.bf16.mxu1 %v3442_v61  ;;  %v3502_v61 = vld [vmem:[%s4666_s13 + $0x34] ss:$8 sps:$4 sm:$0xff]  }
 0x427   :  { %1859 = vmatmul.mubr.bf16.vlgmr.msra.gmra.mrb[12].mxu1 %v1603_v53 }
 0x428   :  { %3117 = vmatpush3.bf16.msra.mxu1 %v3443_v62  ;;  %v3500_v62 = vld [vmem:[%s4666_s13 + $0x30] ss:$8 sps:$4 sm:$0xff]  }
 0x429   :  { %3118 = vmatprep.subr.bf16.mxu1 %v3447_v63  ;;  %v3505_v63 = vld [vmem:[%s4666_s13 + $0x44] ss:$8 sps:$4 sm:$0xff]  }
 0x42c   :  { %3119 = vmatpush3.bf16.msra.mxu1 %v3448_v3  ;;  %v3503_v3 = vld [vmem:[%s4666_s13 + $0x40] ss:$8 sps:$4 sm:$0xff]  }
 0x42d   :  { %3120 = vmatprep.subr.bf16.mxu1 %v3452_v4  ;;  %v3508_v4 = vld [vmem:[%s4666_s13 + $0x54] ss:$8 sps:$4 sm:$0xff]  }
 0x430   :  { %3121 = vmatpush3.bf16.msra.mxu1 %v3453_v5  ;;  %v3506_v5 = vld [vmem:[%s4666_s13 + $0x50] ss:$8 sps:$4 sm:$0xff]  }
 0x431   :  { %3122 = vmatprep.subr.bf16.mxu1 %v3457_v6  ;;  %v3511_v6 = vld [vmem:[%s4666_s13 + $0x64] ss:$8 sps:$4 sm:$0xff]  }
 0x434   :  { %3123 = vmatpush3.bf16.msra.mxu1 %v3458_v7  ;;  %v3509_v7 = vld [vmem:[%s4666_s13 + $0x60] ss:$8 sps:$4 sm:$0xff]  }
 0x435   :  { %3124 = vmatprep.subr.bf16.mxu1 %v3462_v8  ;;  %v3514_v8 = vld [vmem:[%s4666_s13 + $0x74] ss:$8 sps:$4 sm:$0xff]  }
 0x438   :  { %3125 = vmatpush3.bf16.msra.mxu1 %v3463_v9  ;;  %v3512_v9 = vld [vmem:[%s4666_s13 + $0x70] ss:$8 sps:$4 sm:$0xff]  }
 0x439   :  { %3126 = vmatprep.subr.bf16.mxu1 %v3467_v10  ;;  %v3517_v10 = vld [vmem:[%s4666_s13 + $0x84] ss:$8 sps:$4 sm:$0xff]  }
 0x43c   :  { %3127 = vmatpush3.bf16.msra.mxu1 %v3468_v11  ;;  %v3515_v11 = vld [vmem:[%s4666_s13 + $0x80] ss:$8 sps:$4 sm:$0xff]  }
 0x43d   :  { %3128 = vmatprep.subr.bf16.mxu1 %v3472_v13  ;;  %v3518_v13 = vld [vmem:[%s4666_s13 + $0x90] ss:$8 sps:$4 sm:$0xff]  }
 0x440   :  { %3129 = vmatpush3.bf16.msra.mxu1 %v3473_v15  ;;  %v3521_v15 = vld [vmem:[%s4666_s13 + $0xa0] ss:$8 sps:$4 sm:$0xff]  }
 0x441   :  { %3130 = vmatprep.subr.bf16.mxu1 %v3477_v17  ;;  %v3524_v17 = vld [vmem:[%s4666_s13 + $0xb0] ss:$8 sps:$4 sm:$0xff]  }
 0x444   :  { %3131 = vmatpush3.bf16.msra.mxu1 %v3478_v19  ;;  %v3527_v19 = vld [vmem:[%s4666_s13 + $0xc0] ss:$8 sps:$4 sm:$0xff]  }
 0x445   :  { %3152 = vmatprep.subr.bf16.mxu1 %v3672_v22 }
 0x4d2   :  { %v1819_v25 = vpop.f32.mrb[8].mxu1 }
 0x4d3   :  { %v1820_v26 = vadd.f32 %v1819_v25, %v1609_v23  ;;  %v1821_v27 = vpop.f32.mrb[9].mxu1  ;;  %v3535_v23 = vld [vmem:[%s4666_s13 + $0xe4] ss:$8 sps:$4 sm:$0xff]   ;;  %v3538_v25 = vld [vmem:[%s4666_s13 + $0xf4] ss:$8 sps:$4 sm:$0xff]  }
 0x4d4   :  { %v1822_v28 = vadd.f32 %v1821_v27, %v1613_v24  ;;  %v1823_v29 = vpop.f32.mrb[10].mxu1  ;;  %v3533_v24 = vld [vmem:[%s4666_s13 + $0xe0] ss:$8 sps:$4 sm:$0xff]   ;;  %v3541_v27 = vld [vmem:[%s4666_s13 + $0x104] ss:$8 sps:$4 sm:$0xff]  }
 0x4d5   :  { %v1866_v30 = vmax.f32 %v1820_v26, 0.0  ;;  %v1824_v31 = vpop.f32.mrb[11].mxu1  ;;  %v3536_v26 = vld [vmem:[%s4666_s13 + $0xf0] ss:$8 sps:$4 sm:$0xff]   ;;  %v3549_v29 = vld [vmem:[%s4668_s15 + $0x8] sm:$0xff]  }
 0x4d6   :  { %v1867_v32 = vmax.f32 %v1822_v28, 0.0  ;;  %v3548_v28 = vld [vmem:[%s4668_s15] sm:$0xff]   ;;  %v3551_v31 = vld [vmem:[%s4668_s15 + $0x18] sm:$0xff]  }
 0x4d7   :  { %v1869_v36 = vpack.c.bf16 %v1866_v30, %v1866_v30  ;;  %v3550_v30 = vld [vmem:[%s4668_s15 + $0x10] sm:$0xff]  }
 0x4d8   :  { %v1870_v33 = vpack.c.bf16 %v1867_v32, %v1867_v32  ;;  %v3552_v32 = vld [vmem:[%s4668_s15 + $0x20] sm:$0xff]  }
 0x4da   :  { %2233 = vmatprep.mubr.bf16.mxu0 %v1870_v33  ;;  %2315 = vmatprep.mubr.bf16.mxu1 %v1870_v33  ;;  %v3553_v33 = vld [vmem:[%s4668_s15 + $0x28] sm:$0xff]  }
 0x4db   :  { %2234 = vmatmul.mubr.bf16.vlgmr.msra.gmra.mrb[24].mxu0 %v1869_v36  ;;  %2316 = vmatmul.mubr.bf16.vlgmr.msra.gmra.mrb[16].mxu1 %v1869_v36 }
 0x4dc   :  { %2243 = vmatpush1.bf16.msra.mxu0 %v3479_v34  ;;  %3153 = vmatpush3.bf16.msra.mxu1 %v3482_v35  ;;  %v3554_v34 = vld [vmem:[%s4668_s15 + $0x30] sm:$0xff]  }
 0x4dd   :  { %2244 = vmatprep.subr.bf16.mxu0 %v3485_v37  ;;  %3154 = vmatprep.subr.bf16.mxu1 %v3672_v22 }
 0x4de   :  { %2274 = vmatprep.mubr.bf16.mxu0 %v3671_v0  ;;  %3158 = vmatprep.mubr.msk.bf16.mxu1 %vm3673_vm6, %v3672_v22 }
 0x4e0   :  { %2245 = vmatpush1.bf16.msra.mxu0 %v3483_v38  ;;  %3155 = vmatpush3.bf16.msra.mxu1 %v3486_v39 }
 0x4e1   :  { %3033 = vmatprep.subr.msk.bf16.mxu0 %vm1131_vm4, %v3487_v40  ;;  %3156 = vmatprep.subr.bf16.mxu1 %v3672_v22  ;;  %v3491_v22 = vld [vmem:[%s4666_s13] ss:$8 sps:$4 sm:$0xff]  }
 0x4e2   :  { %v375_v40 = vld [vmem:[%s4665_s12] sm:$0x7] }
 0x4e3   :  { %v1884_v41 = vrot.slane %v375_v40, %v4053_v43  ;;  %v1876_v42 = vrot.slane %v375_v40, %v3921_v47  ;;  %v3539_v43 = vld [vmem:[%s4666_s13 + $0x100] ss:$8 sps:$4 sm:$0xff]  }
 0x4e4   :  { %2247 = vmatpush1.bf16.msra.mxu0 %v2193_v44  ;;  %3157 = vmatpush3.bf16.msra.mxu1 %v2199_v45  ;;  %v1880_v44 = vrot.slane %v375_v40, %v3924_v49 }
 0x4e5   :  { %2577 = vmatprep.subr.bf16.mxu1 %v3493_v51  ;;  %2734 = vmatprep.subr.bf16.mxu0 %v3671_v0 }
 0x4fa   :  { %v1860_v53 = vpop.f32.mrb[12].mxu1 }
 0x4fb   :  { %v1861_v54 = vadd.f32 %v1860_v53, %v1617_v52  ;;  %v1862_v1 = vpop.f32.mrb[13].mxu1 }
 0x4fc   :  { %v1863_v2 = vpop.f32.mrb[14].mxu1 }
 0x4fd   :  { %v1868_v55 = vmax.f32 %v1861_v54, 0.0  ;;  %v1864_v56 = vpop.f32.mrb[15].mxu1 }
 0x4ff   :  { %v1871_v57 = vpack.c.bf16 %v1868_v55, %v1868_v55 }
 0x501   :  { %3034 = vmatmul.mubr.msk.bf16.vlgmr.msra.gmra.mrb[24].mxu0 %vm1127_vm5, %v1871_v57  ;;  %3159 = vmatmul.mubr.msk.bf16.vlgmr.msra.gmra.mrb[20].mxu1 %vm1127_vm5, %v1871_v57 }
 0x502   :  { %2578 = vmatpush1.bf16.msra.mxu1 %v3491_v22  ;;  %2735 = vmatpush1.bf16.msra.mxu0 %v3548_v28 }
 0x503   :  { %2579 = vmatprep.subr.bf16.mxu1 %v3496_v58  ;;  %2736 = vmatprep.subr.bf16.mxu0 %v3671_v0 }
 0x506   :  { %2580 = vmatpush1.bf16.msra.mxu1 %v3494_v46  ;;  %2737 = vmatpush1.bf16.msra.mxu0 %v3549_v29 }
 0x507   :  { %2581 = vmatprep.subr.bf16.mxu1 %v3499_v59  ;;  %2738 = vmatprep.subr.bf16.mxu0 %v3671_v0 }
 0x50a   :  { %2582 = vmatpush1.bf16.msra.mxu1 %v3497_v60  ;;  %2739 = vmatpush1.bf16.msra.mxu0 %v3550_v30 }
 0x50b   :  { %2583 = vmatprep.subr.bf16.mxu1 %v3502_v61  ;;  %2740 = vmatprep.subr.bf16.mxu0 %v3671_v0 }
 0x50e   :  { %2584 = vmatpush1.bf16.msra.mxu1 %v3500_v62  ;;  %2741 = vmatpush1.bf16.msra.mxu0 %v3551_v31  ;;  %v3544_v62 = vld [vmem:[%s4666_s13 + $0x114] ss:$8 sps:$4 sm:$0xff]  }
 0x50f   :  { %2585 = vmatprep.subr.bf16.mxu1 %v3505_v63  ;;  %2742 = vmatprep.subr.bf16.mxu0 %v3671_v0  ;;  %v3542_v63 = vld [vmem:[%s4666_s13 + $0x110] ss:$8 sps:$4 sm:$0xff]  }
 0x512   :  { %2586 = vmatpush1.bf16.msra.mxu1 %v3503_v3  ;;  %2743 = vmatpush1.bf16.msra.mxu0 %v3552_v32  ;;  %v3545_v3 = vld [vmem:[%s4666_s13 + $0x124] ss:$8 sps:$4 sm:$0x3f]  }
 0x513   :  { %2587 = vmatprep.subr.bf16.mxu1 %v3508_v4  ;;  %2744 = vmatprep.subr.bf16.mxu0 %v3671_v0  ;;  %v3547_v4 = vld [vmem:[%s4666_s13 + $0x120] ss:$8 sps:$4 sm:$0x3f]  }
 0x516   :  { %2588 = vmatpush1.bf16.msra.mxu1 %v3506_v5  ;;  %2745 = vmatpush1.bf16.msra.mxu0 %v3553_v33 }
 0x517   :  { %2589 = vmatprep.subr.bf16.mxu1 %v3511_v6  ;;  %2746 = vmatprep.subr.bf16.mxu0 %v3671_v0  ;;  %v2572_v6 = vsel %vm1131_vm4, %v3547_v4, 0 }
 0x51a   :  { %2590 = vmatpush1.bf16.msra.mxu1 %v3509_v7  ;;  %2747 = vmatpush1.bf16.msra.mxu0 %v3554_v34 }
 0x51b   :  { %2591 = vmatprep.subr.bf16.mxu1 %v3514_v8  ;;  %2748 = vmatprep.subr.bf16.mxu0 %v3671_v0  ;;  %v3555_v8 = vld [vmem:[%s4668_s15 + $0x38] sm:$0xff]  }
 0x51e   :  { %2592 = vmatpush1.bf16.msra.mxu1 %v3512_v9  ;;  %2749 = vmatpush1.bf16.msra.mxu0 %v3555_v8  ;;  %v3556_v9 = vld [vmem:[%s4668_s15 + $0x40] sm:$0xff]  }
 0x51f   :  { %2593 = vmatprep.subr.bf16.mxu1 %v3517_v10  ;;  %2750 = vmatprep.subr.bf16.mxu0 %v3671_v0  ;;  %v3557_v10 = vld [vmem:[%s4668_s15 + $0x48] ss:$0 sps:$4 sm:$0x77]  }
 0x522   :  { %2594 = vmatpush1.bf16.msra.mxu1 %v3515_v11  ;;  %2751 = vmatpush1.bf16.msra.mxu0 %v3556_v9  ;;  %v2732_v11 = vsel %vm713_vm2, %v3557_v10, 0 }
 0x523   :  { %2595 = vmatprep.subr.bf16.mxu1 %v3520_v12  ;;  %2752 = vmatprep.subr.bf16.mxu0 %v3671_v0  ;;  %v414_v12 = vld [vmem:[%s4667_s14] sm:$0x3] }
 0x526   :  { %2596 = vmatpush1.bf16.msra.mxu1 %v3518_v13  ;;  %2753 = vmatpush1.bf16.msra.mxu0 %v2732_v11  ;;  %v2373_v13 = vrot.slane %v414_v12, %v3921_v47  ;;  %v3076_v47 = vld [vmem:[%s4669_s16] ss:$0 sm:$0xff] }
 0x527   :  { %2597 = vmatprep.subr.bf16.mxu1 %v3523_v14  ;;  %v2377_v14 = vrot.slane %v414_v12, %v3924_v49 }
 0x52a   :  { %2598 = vmatpush1.bf16.msra.mxu1 %v3521_v15 }
 0x52b   :  { %2599 = vmatprep.subr.bf16.mxu1 %v3526_v16 }
 0x52e   :  { %2600 = vmatpush1.bf16.msra.mxu1 %v3524_v17 }
 0x52f   :  { %2601 = vmatprep.subr.bf16.mxu1 %v3529_v18 }
 0x532   :  { %2602 = vmatpush1.bf16.msra.mxu1 %v3527_v19 }
 0x533   :  { %2603 = vmatprep.subr.bf16.mxu1 %v3532_v20 }
 0x536   :  { %2604 = vmatpush1.bf16.msra.mxu1 %v3530_v21 }
 0x537   :  { %2605 = vmatprep.subr.bf16.mxu1 %v3535_v23 }
 0x53a   :  { %2606 = vmatpush1.bf16.msra.mxu1 %v3533_v24 }
 0x53b   :  { %2607 = vmatprep.subr.bf16.mxu1 %v3538_v25 }
 0x53e   :  { %2608 = vmatpush1.bf16.msra.mxu1 %v3536_v26 }
 0x53f   :  { %2618 = vmatprep.subr.bf16.mxu1 %v3541_v27 }
 0x5ae   :  { %v3132_v35 = vpop.f32.mrb[16].mxu1 }
 0x5af   :  { %v3133_v36 = vpop.f32.mrb[17].mxu1 }
 0x5b0   :  { %v3134_v37 = vadd.f32 %v3133_v36, %v3132_v35  ;;  %v3135_v38 = vpop.f32.mrb[18].mxu1 }
 0x5b1   :  { %v3136_v39 = vpop.f32.mrb[19].mxu1 }
 0x5b2   :  { %v2318_v45 = vadd.f32 %v3134_v37, %v1884_v41 }
 0x5d4   :  { %v2276_v51 = vpop.f32.mrb[24].mxu0  ;;  %v2357_v52 = vpop.f32.mrb[20].mxu1 }
 0x5d5   :  { %v3168_v53 = vadd.f32 %v2276_v51, %v1876_v42  ;;  %v2358_v54 = vadd.f32 %v2357_v52, %v2318_v45  ;;  %v2278_v1 = vpop.f32.mrb[25].mxu0  ;;  %v3160_v2 = vpop.f32.mrb[21].mxu1 }
 0x5d6   :  { %v3169_v55 = vadd.f32 %v2278_v1, %v1880_v44  ;;  %v2280_v56 = vpop.f32.mrb[26].mxu0  ;;  %v2360_v22 = vpop.f32.mrb[22].mxu1 }
 0x5d7   :  { %v2363_v57 = vmax.f32 %v3168_v53, 0.0  ;;  %v2281_v58 = vpop.f32.mrb[27].mxu0  ;;  %v3161_v46 = vpop.f32.mrb[23].mxu1  ;;  %v2365_v5 = vmax.f32 %v2358_v54, 0.0 }
 0x5d8   :  { %v2364_v59 = vmax.f32 %v3169_v55, 0.0 }
 0x5d9   :  { %v2366_v61 = vpack.c.bf16 %v2363_v57, %v2363_v57  ;;  %v2368_v7 = vpack.c.bf16 %v2365_v5, %v2365_v5 }
 0x5da   :  { %v2367_v60 = vpack.c.bf16 %v2364_v59, %v2364_v59 }
 0x5dc   :  { %2609 = vmatprep.mubr.bf16.mxu1 %v2367_v60 }
 0x5dd   :  { %2610 = vmatmul.mubr.bf16.vlgmr.msra.gmra.mrb[24].mxu1 %v2366_v61 }
 0x5de   :  { %2619 = vmatpush1.bf16.msra.mxu1 %v3539_v43  ;;  %2650 = vmatprep.mubr.bf16.mxu1 %v3671_v0 }
 0x5df   :  { %2620 = vmatprep.subr.bf16.mxu1 %v3544_v62 }
 0x5e2   :  { %2621 = vmatpush1.bf16.msra.mxu1 %v3542_v63 }
 0x5e3   :  { %3074 = vmatprep.subr.msk.bf16.mxu1 %vm1131_vm4, %v3545_v3 }
 0x5e6   :  { %2623 = vmatpush1.bf16.msra.mxu1 %v2572_v6 }
 0x5e9   :  { %3075 = vmatmul.mubr.msk.bf16.vlgmr.msra.gmra.mrb[24].mxu1 %vm1127_vm5, %v2368_v7 }
 0x6bc   :  { %v2652_v15 = vpop.f32.mrb[24].mxu1 }
 0x6bd   :  { %v3170_v16 = vadd.f32 %v2652_v15, %v2373_v13  ;;  %v2654_v17 = vpop.f32.mrb[25].mxu1 }
 0x6be   :  { %v3171_v18 = vadd.f32 %v2654_v17, %v2377_v14  ;;  %v2656_v0 = vpop.f32.mrb[26].mxu1 }
 0x6bf   :  { %v2659_v19 = vmax.f32 %v3170_v16, 0.0  ;;  %v2657_v20 = vpop.f32.mrb[27].mxu1 }
 0x6c0   :  { %v2660_v21 = vmax.f32 %v3171_v18, 0.0 }
 0x6c1   :  { %v2661_v23 = vadd.f32 %v2659_v19, %v4340_v48 }
 0x6c2   :  { %v2662_v24 = vadd.f32 %v2660_v21, %v4343_v50 }
 0x6c3   :  { %v2663_v26 = vpack.c.bf16 %v2661_v23, %v2661_v23 }
 0x6c4   :  { %v2664_v25 = vpack.c.bf16 %v2662_v24, %v2662_v24 }
 0x6c6   :  { %3087 = vmatprep.mubr.msk.bf16.mxu0 %vm709_vm3, %v2664_v25 }
 0x6c7   :  { %2767 = vmatmul.mubr.bf16.vlgmr.msra.gmra.mrb[28].mxu0 %v2663_v26 }
 0x79a   :  { %v2768_v49 = vpop.f32.mrb[28].mxu0 }
 0x79b   :  { %v2769_v27 = vadd.f32 %v3076_v47, %v2768_v49  ;;  %v2770_v28 = vpop.f32.mrb[29].mxu0 }
 0x79c   :  { %v2771_v29 = vpop.f32.mrb[30].mxu0 }
 0x79d   :  { %v3088_v30 = vmul.f32 -1.442695, %v2769_v27  ;;  %v2772_v31 = vpop.f32.mrb[31].mxu0 }
 0x79f   :  { %3566 = vpow2.f32 %v3088_v30 }
 0x7a9   :  { %v3567_v32 = vpop.eup %3566 }
 0x7aa   :  { %v2777_v48 = vadd.f32 1.0, %v3567_v32 }
 0x7ac   :  { %3568 = vrcp.f32 %v2777_v48 }
 0x7b6   :  { %v3569_v50 = vpop.eup %3568 }
 0x7b7   :  { %v2780_v33 = vmul.f32 6.0, %v3569_v50 }
 0x7b9   :  { %v3089_v34 = vadd.f32 -3.0, %v2780_v33 }
 0x7bb   :  { %2783 = vst.msk [vmem:[#allocation8] sm:$0xff] %vm2782_vm7, %v3089_v34 }
 0x7bc   :  { %3647 = shalt.err (!%p3644_p0)
}
 0x7bd   :  { %s3648_s11 = scalar_lea.hbm %s4670_s17, 128 }
 0x7be   :  { %p3649_p1 = scmp.ne.s32.totalorder %s4670_s17, %s3648_s11  ;;  %p3652_p2 = scmp.lt.u32.totalorder %s3648_s11, %s4670_s17 }
 0x7c0   :  { %p3654_p3 = pnand %p3652_p2, %p3649_p1 }
 0x7c2   :  { %3657 = shalt.err (!%p3654_p3)
}
 0x7c3   :  { %2793 = dma.vmem_to_hbm [thread:$0]  %s2791_s26, 128, %s4670_s17, [#allocation4]  }
 0x7c4   :  { %3662 = dma.done.wait [#allocation4], 128  }
 0x7c5   :  { %3663 = vsyncadd [#allocation4], 4294967168 }
 0x7c6   :  { %2797 = vsyncpa [#allocation3], 1 }
 0x7c7   :  { %2798 = vsyncpa [#allocation6], 1 }
 0x7c8   :  { %2799 = vsyncpa [#allocation4], 1 }

</bundles_post_ra>
